<compile_context>
chip_gen: v5e
topology: v5e:2x2
jax: 0.10.0
libtpu: 0.0.40
codegen_flags: <defaults>
</compile_context>

<pallas_src>
import functools
import numpy as np
import jax
import jax.numpy as jnp
from jax import lax
from jax.experimental import pallas as pl
from jax.experimental.pallas import tpu as pltpu

D_MODEL = 32
N_HEAD = 1            # single head -> head_dim == d_model
DIM_FF = 2048         # PyTorch TransformerEncoderLayer default dim_feedforward
LN_EPS = 1e-5
PE_MAX_LEN = 100      # PositionalEncoding default max_len

# rows of the packed (8, D) vector-parameter array
_ROW_BO, _ROW_LN1G, _ROW_LN1B, _ROW_B2, _ROW_LN2G, _ROW_LN2B, _ROW_BH1, _ROW_BH2 = range(8)


def _layernorm(x, gamma, beta):
    # x: (rows, D) f32; gamma/beta: (1, D) f32. Biased variance (PyTorch LayerNorm).
    mu = jnp.mean(x, axis=-1, keepdims=True)
    xc = x - mu
    var = jnp.mean(xc * xc, axis=-1, keepdims=True)
    inv = lax.rsqrt(var + LN_EPS)
    return xc * inv * gamma + beta


def transformer_regressor_kernel(
    tok_ref,          # (TB*S, 1) int32  token ids for this batch tile
    emb_ref,          # (Vp, D)   f32    embedding table (rows padded to mult of 8)
    pe_ref,           # (S, D)    f32    sinusoidal positional encoding
    wqkv_ref,         # (D, 3D)   bf16   fused Q/K/V projection (pre-transposed)
    bqkv_ref,         # (1, 3D)   f32
    wo_ref,           # (D, D)    bf16
    w1_ref,           # (D, F)    bf16
    b1_ref,           # (1, F)    f32
    w2_ref,           # (F, D)    bf16
    wh1_ref,          # (D, D)    bf16
    wh2r_ref,         # (1, D)    bf16   head's 2nd linear weight, (out,in) layout
    p_ref,            # (8, D)    f32    packed biases / LN params (+ bh2 scalar)
    out_ref,          # (1, 1, TB) f32   lane-dense output row
    *,
    ffn_chunk: int,
):
    TBS = tok_ref.shape[0]
    Vp, D = emb_ref.shape
    S = pe_ref.shape[0]
    TB = TBS // S
    F = w1_ref.shape[1]
    scale = 1.0 / float(np.sqrt(D // N_HEAD))

    # ---- embedding lookup (one-hot matmul = exact row select) + PE ----------
    ids = tok_ref[...]                                           # (TBS, 1) int32
    iota = lax.broadcasted_iota(jnp.int32, (TBS, Vp), 1)
    onehot = (iota == ids).astype(jnp.float32)                   # (TBS, Vp)
    emb = jnp.dot(onehot, emb_ref[...],
                  preferred_element_type=jnp.float32)            # (TBS, D) f32
    x_f32 = (emb.reshape(TB, S, D) + pe_ref[...][None, :, :]).reshape(TBS, D)
    x_bf = x_f32.astype(jnp.bfloat16)
    # NOTE: dropout layers are identity in eval mode.

    # ---- fused single-head self-attention ------------------------------------
    qkv = jnp.dot(x_bf, wqkv_ref[...],
                  preferred_element_type=jnp.float32) + bqkv_ref[...]   # (TBS, 3D)
    q = qkv[:, 0:D].reshape(TB, S, D).astype(jnp.bfloat16)
    k = qkv[:, D:2 * D].reshape(TB, S, D).astype(jnp.bfloat16)
    v = qkv[:, 2 * D:3 * D].reshape(TB, S, D).astype(jnp.bfloat16)

    # scores: contract d directly (no transposed copy of k), batch over TB
    scores = lax.dot_general(
        q, k, (((2,), (2,)), ((0,), (0,))),
        preferred_element_type=jnp.float32) * scale                     # (TB, S, S)
    scores = scores - jnp.max(scores, axis=-1, keepdims=True)
    p = jnp.exp(scores)
    p = p * pl.reciprocal(jnp.sum(p, axis=-1, keepdims=True), approx=True)

    ctx = lax.dot_general(
        p.astype(jnp.bfloat16), v, (((2,), (1,)), ((0,), (0,))),
        preferred_element_type=jnp.float32)                             # (TB, S, D)
    ctx = ctx.reshape(TBS, D)

    attn = jnp.dot(ctx.astype(jnp.bfloat16), wo_ref[...],
                   preferred_element_type=jnp.float32) + p_ref[_ROW_BO:_ROW_BO + 1, :]

    # residual + LayerNorm 1 (post-norm, PyTorch norm_first=False)
    x1 = _layernorm(x_f32 + attn,
                    p_ref[_ROW_LN1G:_ROW_LN1G + 1, :],
                    p_ref[_ROW_LN1B:_ROW_LN1B + 1, :])                  # (TBS, D) f32

    # ---- feed-forward, chunked over F ----------------------------------------
    x1_bf = x1.astype(jnp.bfloat16)
    n_chunks = F // ffn_chunk

    def ffn_body(c, acc):
        f0 = pl.multiple_of(c * ffn_chunk, ffn_chunk)
        hc = jnp.dot(x1_bf, w1_ref[:, pl.ds(f0, ffn_chunk)],
                     preferred_element_type=jnp.float32)
        hc = hc + b1_ref[:, pl.ds(f0, ffn_chunk)]
        hc = jnp.maximum(hc, 0.0)
        return acc + jnp.dot(hc.astype(jnp.bfloat16),
                             w2_ref[pl.ds(f0, ffn_chunk), :],
                             preferred_element_type=jnp.float32)

    ff = lax.fori_loop(0, n_chunks, ffn_body,
                       jnp.zeros((TBS, D), jnp.float32), unroll=True)
    ff = ff + p_ref[_ROW_B2:_ROW_B2 + 1, :]

    # residual + LayerNorm 2
    x2 = _layernorm(x1 + ff,
                    p_ref[_ROW_LN2G:_ROW_LN2G + 1, :],
                    p_ref[_ROW_LN2B:_ROW_LN2B + 1, :])                  # (TBS, D)

    # ---- mean pool over sequence dim -----------------------------------------
    pooled = jnp.mean(x2.reshape(TB, S, D), axis=1)                     # (TB, D)

    # ---- head: Linear -> ReLU -> Linear (lane-dense output) -------------------
    h1 = jnp.dot(pooled.astype(jnp.bfloat16), wh1_ref[...],
                 preferred_element_type=jnp.float32) + p_ref[_ROW_BH1:_ROW_BH1 + 1, :]
    h1 = jnp.maximum(h1, 0.0)
    # (1, D) @ (TB, D)^T -> (1, TB): output batch sits in lanes, no transpose needed
    out_row = lax.dot_general(
        wh2r_ref[...], h1.astype(jnp.bfloat16),
        (((1,), (1,)), ((), ())), preferred_element_type=jnp.float32)   # (1, TB)
    out_row = out_row + p_ref[_ROW_BH2:_ROW_BH2 + 1, 0:1]
    out_ref[...] = out_row.reshape(1, 1, TB).astype(out_ref.dtype)


def _resident_spec(shape):
    nd = len(shape)
    return pl.BlockSpec(shape, lambda b, _nd=nd: (0,) * _nd)


def _pick_batch_tile(B, S, max_tb=256):
    """Largest divisor of B that is <= max_tb and (when B >= 2) <= B//2 so the
    grid always has >= 2 steps (v7x megacore).  max_tb=256 keeps the per-step
    VMEM footprint (~20 MiB worst case) well inside v7x's 64 MiB."""
    if B <= 1:
        return B
    cap = max(1, min(max_tb, B // 2))
    for tb in range(cap, 0, -1):
        if B % tb == 0 and ((tb * S) % 8 == 0 or tb * S == B * S):
            return tb
    return B   # fallback: single step with full-array blocks


def _pick_ffn_chunk(F):
    for fc in (512, 256, 128):
        if F % fc == 0:
            return fc
    return F


def prepare_params(params, d_model=D_MODEL, max_len=PE_MAX_LEN):
    """One-time parameter preparation (fusion, bf16 casts, PE table).
    Keep this out of the per-call path."""
    D = d_model

    # sinusoidal positional encoding table (host-side numpy, built once)
    position = np.arange(0, max_len, dtype=np.float32)[:, None]
    div_term = np.exp(np.arange(0, D, 2, dtype=np.float32) *
                      (-np.log(10000.0) / D))
    pe = np.zeros((max_len, D), dtype=np.float32)
    pe[:, 0::2] = np.sin(position * div_term)
    pe[:, 1::2] = np.cos(position * div_term)

    # embedding table, rows padded to a multiple of 8 (sublane tile)
    emb = params['embedding'].astype(jnp.float32)
    V = emb.shape[0]
    V_pad = ((V + 7) // 8) * 8
    if V_pad != V:
        emb = jnp.concatenate([emb, jnp.zeros((V_pad - V, D), jnp.float32)], axis=0)

    bh2_row = jnp.concatenate(
        [params['bh2'], jnp.zeros((1, D - 1), jnp.float32)], axis=1)
    vec_params = jnp.concatenate(
        [params['bo'], params['ln1_g'], params['ln1_b'], params['b2'],
         params['ln2_g'], params['ln2_b'], params['bh1'], bh2_row],
        axis=0)                                                     # (8, D) f32

    prep = {
        'emb': emb,                                                  # (Vp, D) f32
        'pe': jnp.asarray(pe),                                       # (max_len, D) f32
        'wqkv': jnp.concatenate([params['wq_t'], params['wk_t'], params['wv_t']],
                                axis=1).astype(jnp.bfloat16),        # (D, 3D)
        'bqkv': jnp.concatenate([params['bq'], params['bk'], params['bv']],
                                axis=1).astype(jnp.float32),         # (1, 3D)
        'wo': params['wo_t'].astype(jnp.bfloat16),
        'w1': params['w1_t'].astype(jnp.bfloat16),
        'b1': params['b1'].astype(jnp.float32),
        'w2': params['w2_t'].astype(jnp.bfloat16),
        'wh1': params['wh1_t'].astype(jnp.bfloat16),
        'wh2r': params['wh2_t'].T.astype(jnp.bfloat16),              # (1, D)
        'vec': vec_params,
    }
    return jax.tree_util.tree_map(jnp.asarray, prep)


def transformer_regressor_forward(tokens, prep):
    """tokens: int32 (B, S). prep: output of prepare_params. Returns (B, 1) f32."""
    B, S = tokens.shape
    D = prep['emb'].shape[1]
    F = prep['w1'].shape[1]

    pe = prep['pe'][:S]                                  # (S, D), PE sliced to seq len
    tok2d = tokens.reshape(B * S, 1).astype(jnp.int32)

    TB = _pick_batch_tile(B, S)
    G = B // TB
    ffn_chunk = _pick_ffn_chunk(F)

    kernel = functools.partial(transformer_regressor_kernel, ffn_chunk=ffn_chunk)

    weights = [prep['emb'], pe, prep['wqkv'], prep['bqkv'], prep['wo'],
               prep['w1'], prep['b1'], prep['w2'], prep['wh1'], prep['wh2r'],
               prep['vec']]
    in_specs = (
        [pl.BlockSpec((TB * S, 1), lambda b: (b, 0))] +
        [_resident_spec(a.shape) for a in weights]
    )

    out = pl.pallas_call(
        kernel,
        out_shape=jax.ShapeDtypeStruct((G, 1, TB), jnp.float32),
        grid=(G,),
        in_specs=in_specs,
        out_specs=pl.BlockSpec((1, 1, TB), lambda b: (b, 0, 0)),
        compiler_params=pltpu.CompilerParams(
            dimension_semantics=("parallel",),   # megacore on v7x; harmless elsewhere
            vmem_limit_bytes=40 << 20,           # ~2x headroom over worst-case tile use
        ),
    )(tok2d, *weights)
    return out.reshape(B, 1)


def init_params(key, vocab_size, d_model=D_MODEL, dim_ff=DIM_FF):
    ks = jax.random.split(key, 16)
    s = 0.02

    def nrm(k, shape):
        return jax.random.normal(k, shape, jnp.float32) * s

    # PyTorch stores Linear weights as (out, in); we pre-transpose to (in, out).
    p = {
        'embedding': nrm(ks[0], (vocab_size, d_model)),
        'wq_t': nrm(ks[1], (d_model, d_model)),
        'wk_t': nrm(ks[2], (d_model, d_model)),
        'wv_t': nrm(ks[3], (d_model, d_model)),
        'bq': nrm(ks[4], (1, d_model)),
        'bk': nrm(ks[5], (1, d_model)),
        'bv': nrm(ks[6], (1, d_model)),
        'wo_t': nrm(ks[7], (d_model, d_model)),
        'bo': nrm(ks[8], (1, d_model)),
        'ln1_g': jnp.ones((1, d_model), jnp.float32),
        'ln1_b': jnp.zeros((1, d_model), jnp.float32),
        'w1_t': nrm(ks[9], (d_model, dim_ff)),
        'b1': nrm(ks[10], (1, dim_ff)),
        'w2_t': nrm(ks[11], (dim_ff, d_model)),
        'b2': nrm(ks[12], (1, d_model)),
        'ln2_g': jnp.ones((1, d_model), jnp.float32),
        'ln2_b': jnp.zeros((1, d_model), jnp.float32),
        'wh1_t': nrm(ks[13], (d_model, d_model)),
        'bh1': nrm(ks[14], (1, d_model)),
        'wh2_t': nrm(ks[15], (d_model, 1)),
        'bh2': jnp.zeros((1, 1), jnp.float32),
    }
    return p


if __name__ == "__main__":
    key = jax.random.PRNGKey(0)
    k_tok, k_par = jax.random.split(key)

    B, S = 2, 8
    vocab_size = 20   # synthetic vocab (original script derives it from a CSV)
    tokens = jax.random.randint(k_tok, (B, S), 0, vocab_size, dtype=jnp.int32)

    params = init_params(k_par, vocab_size)
    prep = prepare_params(params)               # one-time weight fusion / casts

    fwd = jax.jit(transformer_regressor_forward)
    out = fwd(tokens, prep)
    out = jax.block_until_ready(out)
    assert out.shape == (B, 1) and out.dtype == jnp.float32
    assert bool(jnp.all(jnp.isfinite(out)))
    print("KERNEL_OK")
</pallas_src>

<mosaic_0001>
module attributes {stable_mosaic.version = 11 : i64} {
  func.func @transformer_regressor_kernel(%arg0: i32, %arg1: memref<8x1xi32, #tpu.memory_space<vmem>>, %arg2: memref<24x32xf32, #tpu.memory_space<vmem>>, %arg3: memref<8x32xf32, #tpu.memory_space<vmem>>, %arg4: memref<32x96xbf16, #tpu.memory_space<vmem>>, %arg5: memref<1x96xf32, #tpu.memory_space<vmem>>, %arg6: memref<32x32xbf16, #tpu.memory_space<vmem>>, %arg7: memref<32x2048xbf16, #tpu.memory_space<vmem>>, %arg8: memref<1x2048xf32, #tpu.memory_space<vmem>>, %arg9: memref<2048x32xbf16, #tpu.memory_space<vmem>>, %arg10: memref<32x32xbf16, #tpu.memory_space<vmem>>, %arg11: memref<1x32xbf16, #tpu.memory_space<vmem>>, %arg12: memref<8x32xf32, #tpu.memory_space<vmem>>, %arg13: memref<1x1x1xf32, #tpu.memory_space<vmem>>) attributes {dimension_semantics = [#tpu.dimension_semantics<parallel>], iteration_bounds = array<i64: 2>, scalar_prefetch = 0 : i64, scratch_operands = 0 : i64, tpu.core_type = #tpu.core_type<tc>, window_params = [{transform_indices = @transform_0, window_bounds = array<i64: 8, 1>}, {pipeline_mode = #tpu.pipeline_mode<synchronous>, transform_indices = @transform_1, window_bounds = array<i64: 24, 32>}, {pipeline_mode = #tpu.pipeline_mode<synchronous>, transform_indices = @transform_2, window_bounds = array<i64: 8, 32>}, {pipeline_mode = #tpu.pipeline_mode<synchronous>, transform_indices = @transform_3, window_bounds = array<i64: 32, 96>}, {pipeline_mode = #tpu.pipeline_mode<synchronous>, transform_indices = @transform_4, window_bounds = array<i64: 1, 96>}, {pipeline_mode = #tpu.pipeline_mode<synchronous>, transform_indices = @transform_5, window_bounds = array<i64: 32, 32>}, {pipeline_mode = #tpu.pipeline_mode<synchronous>, transform_indices = @transform_6, window_bounds = array<i64: 32, 2048>}, {pipeline_mode = #tpu.pipeline_mode<synchronous>, transform_indices = @transform_7, window_bounds = array<i64: 1, 2048>}, {pipeline_mode = #tpu.pipeline_mode<synchronous>, transform_indices = @transform_8, window_bounds = array<i64: 2048, 32>}, {pipeline_mode = #tpu.pipeline_mode<synchronous>, transform_indices = @transform_9, window_bounds = array<i64: 32, 32>}, {pipeline_mode = #tpu.pipeline_mode<synchronous>, transform_indices = @transform_10, window_bounds = array<i64: 1, 32>}, {pipeline_mode = #tpu.pipeline_mode<synchronous>, transform_indices = @transform_11, window_bounds = array<i64: 8, 32>}, {transform_indices = @transform_12, window_bounds = array<i64: 1, 1, 1>}]} {
    %c0 = arith.constant 0 : index
    %c0_0 = arith.constant 0 : index
    %0 = vector.load %arg1[%c0, %c0_0] : memref<8x1xi32, #tpu.memory_space<vmem>>, vector<8x1xi32>
    %1 = tpu.iota {dimensions = array<i32: 1>} : vector<8x24xi32>
    %2 = vector.broadcast %0 : vector<8x1xi32> to vector<8x24xi32>
    %3 = arith.cmpi eq, %1, %2 : vector<8x24xi32>
    %4 = arith.extui %3 : vector<8x24xi1> to vector<8x24xi32>
    %5 = arith.sitofp %4 : vector<8x24xi32> to vector<8x24xf32>
    %c0_1 = arith.constant 0 : index
    %c0_2 = arith.constant 0 : index
    %6 = vector.load %arg2[%c0_1, %c0_2] : memref<24x32xf32, #tpu.memory_space<vmem>>, vector<24x32xf32>
    %cst = arith.constant dense<0.000000e+00> : vector<8x32xf32>
    %7 = tpu.matmul %5, %6, %cst {dimension_numbers = #tpu.dot_dimension_numbers<[1], [0], [0], [1], [0, 0, 1, 1], [], []>} : vector<8x24xf32>, vector<24x32xf32>, vector<8x32xf32> -> vector<8x32xf32>
    %8 = vector.shape_cast %7 : vector<8x32xf32> to vector<1x8x32xf32>
    %c0_3 = arith.constant 0 : index
    %c0_4 = arith.constant 0 : index
    %9 = vector.load %arg3[%c0_3, %c0_4] : memref<8x32xf32, #tpu.memory_space<vmem>>, vector<8x32xf32>
    %10 = vector.shape_cast %9 : vector<8x32xf32> to vector<1x8x32xf32>
    %11 = arith.addf %8, %10 : vector<1x8x32xf32>
    %12 = vector.shape_cast %11 : vector<1x8x32xf32> to vector<8x32xf32>
    %13 = arith.truncf %12 : vector<8x32xf32> to vector<8x32xbf16>
    %c0_5 = arith.constant 0 : index
    %c0_6 = arith.constant 0 : index
    %14 = vector.load %arg4[%c0_5, %c0_6] : memref<32x96xbf16, #tpu.memory_space<vmem>>, vector<32x96xbf16>
    %cst_7 = arith.constant dense<0.000000e+00> : vector<8x96xf32>
    %15 = tpu.matmul %13, %14, %cst_7 {dimension_numbers = #tpu.dot_dimension_numbers<[1], [0], [0], [1], [0, 0, 1, 1], [], []>} : vector<8x32xbf16>, vector<32x96xbf16>, vector<8x96xf32> -> vector<8x96xf32>
    %c0_8 = arith.constant 0 : index
    %c0_9 = arith.constant 0 : index
    %16 = vector.load %arg5[%c0_8, %c0_9] : memref<1x96xf32, #tpu.memory_space<vmem>>, vector<1x96xf32>
    %17 = vector.broadcast %16 : vector<1x96xf32> to vector<8x96xf32>
    %18 = arith.addf %15, %17 : vector<8x96xf32>
    %19 = vector.extract_strided_slice %18 {offsets = [0, 0], sizes = [8, 32], strides = [1, 1]} : vector<8x96xf32> to vector<8x32xf32>
    %20 = vector.shape_cast %19 : vector<8x32xf32> to vector<1x8x32xf32>
    %21 = arith.truncf %20 : vector<1x8x32xf32> to vector<1x8x32xbf16>
    %22 = vector.extract_strided_slice %18 {offsets = [0, 32], sizes = [8, 32], strides = [1, 1]} : vector<8x96xf32> to vector<8x32xf32>
    %23 = vector.shape_cast %22 : vector<8x32xf32> to vector<1x8x32xf32>
    %24 = arith.truncf %23 : vector<1x8x32xf32> to vector<1x8x32xbf16>
    %25 = vector.extract_strided_slice %18 {offsets = [0, 64], sizes = [8, 32], strides = [1, 1]} : vector<8x96xf32> to vector<8x32xf32>
    %26 = vector.shape_cast %25 : vector<8x32xf32> to vector<1x8x32xf32>
    %27 = arith.truncf %26 : vector<1x8x32xf32> to vector<1x8x32xbf16>
    %cst_10 = arith.constant dense<0.000000e+00> : vector<1x8x8xf32>
    %28 = tpu.matmul %21, %24, %cst_10 {dimension_numbers = #tpu.dot_dimension_numbers<[2], [2], [1], [1], [0, 0, 0, 1, 1, 1], [0], [0]>} : vector<1x8x32xbf16>, vector<1x8x32xbf16>, vector<1x8x8xf32> -> vector<1x8x8xf32>
    %cst_11 = arith.constant 0.176776692 : f32
    %29 = vector.broadcast %cst_11 : f32 to vector<1x8x8xf32>
    %30 = arith.mulf %28, %29 : vector<1x8x8xf32>
    %cst_12 = arith.constant dense<0xFF800000> : vector<1x8xf32>
    %31 = vector.multi_reduction <maximumf>, %30, %cst_12 [2] : vector<1x8x8xf32> to vector<1x8xf32>
    %32 = vector.shape_cast %31 : vector<1x8xf32> to vector<1x8x1xf32>
    %33 = vector.broadcast %32 : vector<1x8x1xf32> to vector<1x8x8xf32>
    %34 = arith.subf %30, %33 : vector<1x8x8xf32>
    %35 = math.exp %34 : vector<1x8x8xf32>
    %cst_13 = arith.constant dense<0.000000e+00> : vector<1x8xf32>
    %36 = vector.multi_reduction <add>, %35, %cst_13 [2] : vector<1x8x8xf32> to vector<1x8xf32>
    %37 = vector.shape_cast %36 : vector<1x8xf32> to vector<1x8x1xf32>
    %38 = tpu.reciprocal %37 {approx = true} : vector<1x8x1xf32> -> vector<1x8x1xf32>
    %39 = vector.broadcast %38 : vector<1x8x1xf32> to vector<1x8x8xf32>
    %40 = arith.mulf %35, %39 : vector<1x8x8xf32>
    %41 = arith.truncf %40 : vector<1x8x8xf32> to vector<1x8x8xbf16>
    %cst_14 = arith.constant dense<0.000000e+00> : vector<1x8x32xf32>
    %42 = tpu.matmul %41, %27, %cst_14 {dimension_numbers = #tpu.dot_dimension_numbers<[2], [1], [1], [2], [0, 0, 0, 1, 1, 2], [0], [0]>} : vector<1x8x8xbf16>, vector<1x8x32xbf16>, vector<1x8x32xf32> -> vector<1x8x32xf32>
    %43 = vector.shape_cast %42 : vector<1x8x32xf32> to vector<8x32xf32>
    %44 = arith.truncf %43 : vector<8x32xf32> to vector<8x32xbf16>
    %c0_15 = arith.constant 0 : index
    %c0_16 = arith.constant 0 : index
    %45 = vector.load %arg6[%c0_15, %c0_16] : memref<32x32xbf16, #tpu.memory_space<vmem>>, vector<32x32xbf16>
    %cst_17 = arith.constant dense<0.000000e+00> : vector<8x32xf32>
    %46 = tpu.matmul %44, %45, %cst_17 {dimension_numbers = #tpu.dot_dimension_numbers<[1], [0], [0], [1], [0, 0, 1, 1], [], []>} : vector<8x32xbf16>, vector<32x32xbf16>, vector<8x32xf32> -> vector<8x32xf32>
    %c0_18 = arith.constant 0 : index
    %c0_19 = arith.constant 0 : index
    %47 = vector.load %arg12[%c0_18, %c0_19] : memref<8x32xf32, #tpu.memory_space<vmem>>, vector<1x32xf32>
    %48 = vector.broadcast %47 : vector<1x32xf32> to vector<8x32xf32>
    %49 = arith.addf %46, %48 : vector<8x32xf32>
    %50 = arith.addf %12, %49 : vector<8x32xf32>
    %c1 = arith.constant 1 : index
    %c0_20 = arith.constant 0 : index
    %51 = vector.load %arg12[%c1, %c0_20] : memref<8x32xf32, #tpu.memory_space<vmem>>, vector<1x32xf32>
    %c2 = arith.constant 2 : index
    %c0_21 = arith.constant 0 : index
    %52 = vector.load %arg12[%c2, %c0_21] : memref<8x32xf32, #tpu.memory_space<vmem>>, vector<1x32xf32>
    %cst_22 = arith.constant dense<0.000000e+00> : vector<8xf32>
    %53 = vector.multi_reduction <add>, %50, %cst_22 [1] : vector<8x32xf32> to vector<8xf32>
    %54 = vector.shape_cast %53 : vector<8xf32> to vector<8x1xf32>
    %cst_23 = arith.constant 3.200000e+01 : f32
    %55 = vector.broadcast %cst_23 : f32 to vector<8x1xf32>
    %56 = arith.divf %54, %55 : vector<8x1xf32>
    %57 = vector.broadcast %56 : vector<8x1xf32> to vector<8x32xf32>
    %58 = arith.subf %50, %57 : vector<8x32xf32>
    %59 = arith.mulf %58, %58 : vector<8x32xf32>
    %cst_24 = arith.constant dense<0.000000e+00> : vector<8xf32>
    %60 = vector.multi_reduction <add>, %59, %cst_24 [1] : vector<8x32xf32> to vector<8xf32>
    %61 = vector.shape_cast %60 : vector<8xf32> to vector<8x1xf32>
    %cst_25 = arith.constant 3.200000e+01 : f32
    %62 = vector.broadcast %cst_25 : f32 to vector<8x1xf32>
    %63 = arith.divf %61, %62 : vector<8x1xf32>
    %cst_26 = arith.constant 9.99999974E-6 : f32
    %64 = vector.broadcast %cst_26 : f32 to vector<8x1xf32>
    %65 = arith.addf %63, %64 : vector<8x1xf32>
    %66 = math.rsqrt %65 : vector<8x1xf32>
    %67 = vector.broadcast %66 : vector<8x1xf32> to vector<8x32xf32>
    %68 = arith.mulf %58, %67 : vector<8x32xf32>
    %69 = vector.broadcast %51 : vector<1x32xf32> to vector<8x32xf32>
    %70 = arith.mulf %68, %69 : vector<8x32xf32>
    %71 = vector.broadcast %52 : vector<1x32xf32> to vector<8x32xf32>
    %72 = arith.addf %70, %71 : vector<8x32xf32>
    %73 = arith.truncf %72 : vector<8x32xf32> to vector<8x32xbf16>
    %cst_27 = arith.constant 0.000000e+00 : f32
    %74 = vector.broadcast %cst_27 : f32 to vector<8x32xf32>
    %c0_i32 = arith.constant 0 : i32
    %c512_i32 = arith.constant 512 : i32
    %75 = arith.muli %c0_i32, %c512_i32 : i32
    %76 = tpu.assume_multiple %75, 512 : i32
    %c0_28 = arith.constant 0 : index
    %77 = arith.index_cast %76 : i32 to index
    %78 = vector.load %arg7[%c0_28, %77] : memref<32x2048xbf16, #tpu.memory_space<vmem>>, vector<32x512xbf16>
    %cst_29 = arith.constant dense<0.000000e+00> : vector<8x512xf32>
    %79 = tpu.matmul %73, %78, %cst_29 {dimension_numbers = #tpu.dot_dimension_numbers<[1], [0], [0], [1], [0, 0, 1, 1], [], []>} : vector<8x32xbf16>, vector<32x512xbf16>, vector<8x512xf32> -> vector<8x512xf32>
    %c0_30 = arith.constant 0 : index
    %80 = arith.index_cast %76 : i32 to index
    %81 = vector.load %arg8[%c0_30, %80] : memref<1x2048xf32, #tpu.memory_space<vmem>>, vector<1x512xf32>
    %82 = vector.broadcast %81 : vector<1x512xf32> to vector<8x512xf32>
    %83 = arith.addf %79, %82 : vector<8x512xf32>
    %cst_31 = arith.constant 0.000000e+00 : f32
    %84 = vector.broadcast %cst_31 : f32 to vector<8x512xf32>
    %85 = arith.maximumf %83, %84 : vector<8x512xf32>
    %86 = arith.truncf %85 : vector<8x512xf32> to vector<8x512xbf16>
    %87 = arith.index_cast %76 : i32 to index
    %c0_32 = arith.constant 0 : index
    %88 = vector.load %arg9[%87, %c0_32] : memref<2048x32xbf16, #tpu.memory_space<vmem>>, vector<512x32xbf16>
    %cst_33 = arith.constant dense<0.000000e+00> : vector<8x32xf32>
    %89 = tpu.matmul %86, %88, %cst_33 {dimension_numbers = #tpu.dot_dimension_numbers<[1], [0], [0], [1], [0, 0, 1, 1], [], []>} : vector<8x512xbf16>, vector<512x32xbf16>, vector<8x32xf32> -> vector<8x32xf32>
    %90 = arith.addf %74, %89 : vector<8x32xf32>
    %c1_i32 = arith.constant 1 : i32
    %c512_i32_34 = arith.constant 512 : i32
    %91 = arith.muli %c1_i32, %c512_i32_34 : i32
    %92 = tpu.assume_multiple %91, 512 : i32
    %c0_35 = arith.constant 0 : index
    %93 = arith.index_cast %92 : i32 to index
    %94 = vector.load %arg7[%c0_35, %93] : memref<32x2048xbf16, #tpu.memory_space<vmem>>, vector<32x512xbf16>
    %cst_36 = arith.constant dense<0.000000e+00> : vector<8x512xf32>
    %95 = tpu.matmul %73, %94, %cst_36 {dimension_numbers = #tpu.dot_dimension_numbers<[1], [0], [0], [1], [0, 0, 1, 1], [], []>} : vector<8x32xbf16>, vector<32x512xbf16>, vector<8x512xf32> -> vector<8x512xf32>
    %c0_37 = arith.constant 0 : index
    %96 = arith.index_cast %92 : i32 to index
    %97 = vector.load %arg8[%c0_37, %96] : memref<1x2048xf32, #tpu.memory_space<vmem>>, vector<1x512xf32>
    %98 = vector.broadcast %97 : vector<1x512xf32> to vector<8x512xf32>
    %99 = arith.addf %95, %98 : vector<8x512xf32>
    %cst_38 = arith.constant 0.000000e+00 : f32
    %100 = vector.broadcast %cst_38 : f32 to vector<8x512xf32>
    %101 = arith.maximumf %99, %100 : vector<8x512xf32>
    %102 = arith.truncf %101 : vector<8x512xf32> to vector<8x512xbf16>
    %103 = arith.index_cast %92 : i32 to index
    %c0_39 = arith.constant 0 : index
    %104 = vector.load %arg9[%103, %c0_39] : memref<2048x32xbf16, #tpu.memory_space<vmem>>, vector<512x32xbf16>
    %cst_40 = arith.constant dense<0.000000e+00> : vector<8x32xf32>
    %105 = tpu.matmul %102, %104, %cst_40 {dimension_numbers = #tpu.dot_dimension_numbers<[1], [0], [0], [1], [0, 0, 1, 1], [], []>} : vector<8x512xbf16>, vector<512x32xbf16>, vector<8x32xf32> -> vector<8x32xf32>
    %106 = arith.addf %90, %105 : vector<8x32xf32>
    %c2_i32 = arith.constant 2 : i32
    %c512_i32_41 = arith.constant 512 : i32
    %107 = arith.muli %c2_i32, %c512_i32_41 : i32
    %108 = tpu.assume_multiple %107, 512 : i32
    %c0_42 = arith.constant 0 : index
    %109 = arith.index_cast %108 : i32 to index
    %110 = vector.load %arg7[%c0_42, %109] : memref<32x2048xbf16, #tpu.memory_space<vmem>>, vector<32x512xbf16>
    %cst_43 = arith.constant dense<0.000000e+00> : vector<8x512xf32>
    %111 = tpu.matmul %73, %110, %cst_43 {dimension_numbers = #tpu.dot_dimension_numbers<[1], [0], [0], [1], [0, 0, 1, 1], [], []>} : vector<8x32xbf16>, vector<32x512xbf16>, vector<8x512xf32> -> vector<8x512xf32>
    %c0_44 = arith.constant 0 : index
    %112 = arith.index_cast %108 : i32 to index
    %113 = vector.load %arg8[%c0_44, %112] : memref<1x2048xf32, #tpu.memory_space<vmem>>, vector<1x512xf32>
    %114 = vector.broadcast %113 : vector<1x512xf32> to vector<8x512xf32>
    %115 = arith.addf %111, %114 : vector<8x512xf32>
    %cst_45 = arith.constant 0.000000e+00 : f32
    %116 = vector.broadcast %cst_45 : f32 to vector<8x512xf32>
    %117 = arith.maximumf %115, %116 : vector<8x512xf32>
    %118 = arith.truncf %117 : vector<8x512xf32> to vector<8x512xbf16>
    %119 = arith.index_cast %108 : i32 to index
    %c0_46 = arith.constant 0 : index
    %120 = vector.load %arg9[%119, %c0_46] : memref<2048x32xbf16, #tpu.memory_space<vmem>>, vector<512x32xbf16>
    %cst_47 = arith.constant dense<0.000000e+00> : vector<8x32xf32>
    %121 = tpu.matmul %118, %120, %cst_47 {dimension_numbers = #tpu.dot_dimension_numbers<[1], [0], [0], [1], [0, 0, 1, 1], [], []>} : vector<8x512xbf16>, vector<512x32xbf16>, vector<8x32xf32> -> vector<8x32xf32>
    %122 = arith.addf %106, %121 : vector<8x32xf32>
    %c3_i32 = arith.constant 3 : i32
    %c512_i32_48 = arith.constant 512 : i32
    %123 = arith.muli %c3_i32, %c512_i32_48 : i32
    %124 = tpu.assume_multiple %123, 512 : i32
    %c0_49 = arith.constant 0 : index
    %125 = arith.index_cast %124 : i32 to index
    %126 = vector.load %arg7[%c0_49, %125] : memref<32x2048xbf16, #tpu.memory_space<vmem>>, vector<32x512xbf16>
    %cst_50 = arith.constant dense<0.000000e+00> : vector<8x512xf32>
    %127 = tpu.matmul %73, %126, %cst_50 {dimension_numbers = #tpu.dot_dimension_numbers<[1], [0], [0], [1], [0, 0, 1, 1], [], []>} : vector<8x32xbf16>, vector<32x512xbf16>, vector<8x512xf32> -> vector<8x512xf32>
    %c0_51 = arith.constant 0 : index
    %128 = arith.index_cast %124 : i32 to index
    %129 = vector.load %arg8[%c0_51, %128] : memref<1x2048xf32, #tpu.memory_space<vmem>>, vector<1x512xf32>
    %130 = vector.broadcast %129 : vector<1x512xf32> to vector<8x512xf32>
    %131 = arith.addf %127, %130 : vector<8x512xf32>
    %cst_52 = arith.constant 0.000000e+00 : f32
    %132 = vector.broadcast %cst_52 : f32 to vector<8x512xf32>
    %133 = arith.maximumf %131, %132 : vector<8x512xf32>
    %134 = arith.truncf %133 : vector<8x512xf32> to vector<8x512xbf16>
    %135 = arith.index_cast %124 : i32 to index
    %c0_53 = arith.constant 0 : index
    %136 = vector.load %arg9[%135, %c0_53] : memref<2048x32xbf16, #tpu.memory_space<vmem>>, vector<512x32xbf16>
    %cst_54 = arith.constant dense<0.000000e+00> : vector<8x32xf32>
    %137 = tpu.matmul %134, %136, %cst_54 {dimension_numbers = #tpu.dot_dimension_numbers<[1], [0], [0], [1], [0, 0, 1, 1], [], []>} : vector<8x512xbf16>, vector<512x32xbf16>, vector<8x32xf32> -> vector<8x32xf32>
    %138 = arith.addf %122, %137 : vector<8x32xf32>
    %c4_i32 = arith.constant 4 : i32
    %c3 = arith.constant 3 : index
    %c0_55 = arith.constant 0 : index
    %139 = vector.load %arg12[%c3, %c0_55] : memref<8x32xf32, #tpu.memory_space<vmem>>, vector<1x32xf32>
    %140 = vector.broadcast %139 : vector<1x32xf32> to vector<8x32xf32>
    %141 = arith.addf %138, %140 : vector<8x32xf32>
    %142 = arith.addf %72, %141 : vector<8x32xf32>
    %c4 = arith.constant 4 : index
    %c0_56 = arith.constant 0 : index
    %143 = vector.load %arg12[%c4, %c0_56] : memref<8x32xf32, #tpu.memory_space<vmem>>, vector<1x32xf32>
    %c5 = arith.constant 5 : index
    %c0_57 = arith.constant 0 : index
    %144 = vector.load %arg12[%c5, %c0_57] : memref<8x32xf32, #tpu.memory_space<vmem>>, vector<1x32xf32>
    %cst_58 = arith.constant dense<0.000000e+00> : vector<8xf32>
    %145 = vector.multi_reduction <add>, %142, %cst_58 [1] : vector<8x32xf32> to vector<8xf32>
    %146 = vector.shape_cast %145 : vector<8xf32> to vector<8x1xf32>
    %cst_59 = arith.constant 3.200000e+01 : f32
    %147 = vector.broadcast %cst_59 : f32 to vector<8x1xf32>
    %148 = arith.divf %146, %147 : vector<8x1xf32>
    %149 = vector.broadcast %148 : vector<8x1xf32> to vector<8x32xf32>
    %150 = arith.subf %142, %149 : vector<8x32xf32>
    %151 = arith.mulf %150, %150 : vector<8x32xf32>
    %cst_60 = arith.constant dense<0.000000e+00> : vector<8xf32>
    %152 = vector.multi_reduction <add>, %151, %cst_60 [1] : vector<8x32xf32> to vector<8xf32>
    %153 = vector.shape_cast %152 : vector<8xf32> to vector<8x1xf32>
    %cst_61 = arith.constant 3.200000e+01 : f32
    %154 = vector.broadcast %cst_61 : f32 to vector<8x1xf32>
    %155 = arith.divf %153, %154 : vector<8x1xf32>
    %cst_62 = arith.constant 9.99999974E-6 : f32
    %156 = vector.broadcast %cst_62 : f32 to vector<8x1xf32>
    %157 = arith.addf %155, %156 : vector<8x1xf32>
    %158 = math.rsqrt %157 : vector<8x1xf32>
    %159 = vector.broadcast %158 : vector<8x1xf32> to vector<8x32xf32>
    %160 = arith.mulf %150, %159 : vector<8x32xf32>
    %161 = vector.broadcast %143 : vector<1x32xf32> to vector<8x32xf32>
    %162 = arith.mulf %160, %161 : vector<8x32xf32>
    %163 = vector.broadcast %144 : vector<1x32xf32> to vector<8x32xf32>
    %164 = arith.addf %162, %163 : vector<8x32xf32>
    %165 = vector.shape_cast %164 : vector<8x32xf32> to vector<1x8x32xf32>
    %cst_63 = arith.constant dense<0.000000e+00> : vector<1x32xf32>
    %166 = vector.multi_reduction <add>, %165, %cst_63 [1] : vector<1x8x32xf32> to vector<1x32xf32>
    %cst_64 = arith.constant 8.000000e+00 : f32
    %167 = vector.broadcast %cst_64 : f32 to vector<1x32xf32>
    %168 = arith.divf %166, %167 : vector<1x32xf32>
    %169 = arith.truncf %168 : vector<1x32xf32> to vector<1x32xbf16>
    %c0_65 = arith.constant 0 : index
    %c0_66 = arith.constant 0 : index
    %170 = vector.load %arg10[%c0_65, %c0_66] : memref<32x32xbf16, #tpu.memory_space<vmem>>, vector<32x32xbf16>
    %cst_67 = arith.constant dense<0.000000e+00> : vector<1x32xf32>
    %171 = tpu.matmul %169, %170, %cst_67 {dimension_numbers = #tpu.dot_dimension_numbers<[1], [0], [0], [1], [0, 0, 1, 1], [], []>} : vector<1x32xbf16>, vector<32x32xbf16>, vector<1x32xf32> -> vector<1x32xf32>
    %c6 = arith.constant 6 : index
    %c0_68 = arith.constant 0 : index
    %172 = vector.load %arg12[%c6, %c0_68] : memref<8x32xf32, #tpu.memory_space<vmem>>, vector<1x32xf32>
    %173 = arith.addf %171, %172 : vector<1x32xf32>
    %cst_69 = arith.constant 0.000000e+00 : f32
    %174 = vector.broadcast %cst_69 : f32 to vector<1x32xf32>
    %175 = arith.maximumf %173, %174 : vector<1x32xf32>
    %c0_70 = arith.constant 0 : index
    %c0_71 = arith.constant 0 : index
    %176 = vector.load %arg11[%c0_70, %c0_71] : memref<1x32xbf16, #tpu.memory_space<vmem>>, vector<1x32xbf16>
    %177 = arith.truncf %175 : vector<1x32xf32> to vector<1x32xbf16>
    %178 = arith.extf %176 : vector<1x32xbf16> to vector<1x32xf32>
    %179 = arith.extf %177 : vector<1x32xbf16> to vector<1x32xf32>
    %cst_72 = arith.constant dense<0.000000e+00> : vector<1xf32>
    %180 = arith.mulf %178, %179 : vector<1x32xf32>
    %181 = vector.multi_reduction <add>, %180, %cst_72 [1] : vector<1x32xf32> to vector<1xf32>
    %182 = vector.shape_cast %181 : vector<1xf32> to vector<1x1xf32>
    %c7 = arith.constant 7 : index
    %c0_73 = arith.constant 0 : index
    %183 = vector.load %arg12[%c7, %c0_73] : memref<8x32xf32, #tpu.memory_space<vmem>>, vector<1x1xf32>
    %184 = arith.addf %182, %183 : vector<1x1xf32>
    %185 = vector.shape_cast %184 : vector<1x1xf32> to vector<1x1x1xf32>
    %c0_74 = arith.constant 0 : index
    %c0_75 = arith.constant 0 : index
    %c0_76 = arith.constant 0 : index
    %186 = vector.load %arg13[%c0_74, %c0_75, %c0_76] : memref<1x1x1xf32, #tpu.memory_space<vmem>>, vector<1x1x1xf32>
    tpu.vector_store %arg13[%c0_74, %c0_75, %c0_76], %185 {strides = array<i32>} : memref<1x1x1xf32, #tpu.memory_space<vmem>>, vector<1x1x1xf32>,
    return
  }
  func.func @transform_0(%arg0: i32) -> (i32, i32) {
    %c0_i32 = arith.constant 0 : i32
    %c0_i32_0 = arith.constant 0 : i32
    return %arg0, %c0_i32 : i32, i32
  }
  func.func @transform_1(%arg0: i32) -> (i32, i32) {
    %c0_i32 = arith.constant 0 : i32
    %c0_i32_0 = arith.constant 0 : i32
    %c0_i32_1 = arith.constant 0 : i32
    return %c0_i32, %c0_i32_0 : i32, i32
  }
  func.func @transform_2(%arg0: i32) -> (i32, i32) {
    %c0_i32 = arith.constant 0 : i32
    %c0_i32_0 = arith.constant 0 : i32
    %c0_i32_1 = arith.constant 0 : i32
    return %c0_i32, %c0_i32_0 : i32, i32
  }
  func.func @transform_3(%arg0: i32) -> (i32, i32) {
    %c0_i32 = arith.constant 0 : i32
    %c0_i32_0 = arith.constant 0 : i32
    %c0_i32_1 = arith.constant 0 : i32
    return %c0_i32, %c0_i32_0 : i32, i32
  }
  func.func @transform_4(%arg0: i32) -> (i32, i32) {
    %c0_i32 = arith.constant 0 : i32
    %c0_i32_0 = arith.constant 0 : i32
    %c0_i32_1 = arith.constant 0 : i32
    return %c0_i32, %c0_i32_0 : i32, i32
  }
  func.func @transform_5(%arg0: i32) -> (i32, i32) {
    %c0_i32 = arith.constant 0 : i32
    %c0_i32_0 = arith.constant 0 : i32
    %c0_i32_1 = arith.constant 0 : i32
    return %c0_i32, %c0_i32_0 : i32, i32
  }
  func.func @transform_6(%arg0: i32) -> (i32, i32) {
    %c0_i32 = arith.constant 0 : i32
    %c0_i32_0 = arith.constant 0 : i32
    %c0_i32_1 = arith.constant 0 : i32
    return %c0_i32, %c0_i32_0 : i32, i32
  }
  func.func @transform_7(%arg0: i32) -> (i32, i32) {
    %c0_i32 = arith.constant 0 : i32
    %c0_i32_0 = arith.constant 0 : i32
    %c0_i32_1 = arith.constant 0 : i32
    return %c0_i32, %c0_i32_0 : i32, i32
  }
  func.func @transform_8(%arg0: i32) -> (i32, i32) {
    %c0_i32 = arith.constant 0 : i32
    %c0_i32_0 = arith.constant 0 : i32
    %c0_i32_1 = arith.constant 0 : i32
    return %c0_i32, %c0_i32_0 : i32, i32
  }
  func.func @transform_9(%arg0: i32) -> (i32, i32) {
    %c0_i32 = arith.constant 0 : i32
    %c0_i32_0 = arith.constant 0 : i32
    %c0_i32_1 = arith.constant 0 : i32
    return %c0_i32, %c0_i32_0 : i32, i32
  }
  func.func @transform_10(%arg0: i32) -> (i32, i32) {
    %c0_i32 = arith.constant 0 : i32
    %c0_i32_0 = arith.constant 0 : i32
    %c0_i32_1 = arith.constant 0 : i32
    return %c0_i32, %c0_i32_0 : i32, i32
  }
  func.func @transform_11(%arg0: i32) -> (i32, i32) {
    %c0_i32 = arith.constant 0 : i32
    %c0_i32_0 = arith.constant 0 : i32
    %c0_i32_1 = arith.constant 0 : i32
    return %c0_i32, %c0_i32_0 : i32, i32
  }
  func.func @transform_12(%arg0: i32) -> (i32, i32, i32) {
    %c0_i32 = arith.constant 0 : i32
    %c0_i32_0 = arith.constant 0 : i32
    %c0_i32_1 = arith.constant 0 : i32
    return %arg0, %c0_i32, %c0_i32_0 : i32, i32, i32
  }
}

</mosaic_0001>

<bundles_post_ra>
// kernel: transformer_regressor_forward.1
= control target key start
LH: loop header
LB: loop body
LE: loop exit
PB: predicated region body
PF: predicated region fallthrough
CT: control target
= control target key end

     0   :  { %s3670_s21 = smov 0   ;;  %s4417_s0 = inlined_call_operand.vmem [shape: s32[16,1], index: 0, kind: input, shape index: {}]   ;;  %s4418_s1 = inlined_call_operand.vmem [shape: f32[24,32], index: 1, kind: input, shape index: {}]   ;;  %s4419_s2 = inlined_call_operand.vmem [shape: f32[8,32], index: 2, kind: input, shape index: {}]   ;;  %s4420_s3 = inlined_call_operand.vmem [shape: bf16[32,96], index: 3, kind: input, shape index: {}]   ;;  %s4421_s4 = inlined_call_operand.vmem [shape: f32[1,96], index: 4, kind: input, shape index: {}]   ;;  %s4422_s5 = inlined_call_operand.vmem [shape: bf16[32,32], index: 5, kind: input, shape index: {}]   ;;  %s4423_s6 = inlined_call_operand.vmem [shape: bf16[32,2048], index: 6, kind: input, shape index: {}]   ;;  %s4424_s7 = inlined_call_operand.vmem [shape: f32[1,2048], index: 7, kind: input, shape index: {}]   ;;  %s4425_s8 = inlined_call_operand.vmem [shape: bf16[2048,32], index: 8, kind: input, shape index: {}]   ;;  %s4426_s9 = inlined_call_operand.vmem [shape: bf16[32,32], index: 9, kind: input, shape index: {}]   ;;  %s4427_s10 = inlined_call_operand.vmem [shape: bf16[1,32], index: 10, kind: input, shape index: {}]   ;;  %s4428_s11 = inlined_call_operand.vmem [shape: f32[8,32], index: 11, kind: input, shape index: {}]   ;;  %s4429_s12 = inlined_call_operand.vmem [shape: f32[2,1,1], index: 12, kind: output, shape index: {}]  }
   0x1 LB: > { %s2477_s22 = sadd.s32 4294967295, %s3597_s21   ;;  %p2481_p0 = scmp.ge.s32.totalorder %s3597_s21, 1  ;;  %s3597_s21 = sphi %s3670_s21, %s22_s21  }
   0x2   : > { %p361_p1 = scmp.lt.s32.totalorder %s3597_s21, 3 }
   0x4   : > { %p362_p2 = pnand %p2481_p0, %p361_p1 }
   0x5   : > { %p400_p3 = scmp.lt.s32.totalorder (!%p362_p2), %s2477_s22, 1  ;;  %s3601_s25 = smov (!%p362_p2), 64  }
   0x6   : > { %365 = sbr.rel (%p362_p2) target bundleno = 2612 (0xa34), region = 68  ;;  %s3602_s26 = smov (!%p362_p2), 96  }
   0xb   : > { %v419_v0 = vld [vmem:[%s4418_s1 + $0x10] sm:$0xff]  ;;  %v418_v1 = vld [vmem:[%s4418_s1 + $0x8] sm:$0xff]  ;;  %v3599_v2 = vmov 0   ;;  %s4431_s22 = smov (!%p400_p3, %s2477_s22), 1  ;;  %v417_v4 = vld [vmem:[%s4418_s1] sm:$0xff]  ;;  %v409_v6 = vlaneseq  ;;  %vm420_vm0 = vcmask 195584  }
   0xc   : > { %3571 = vset.pattern.permute.xlu0 %v3599_v2  ;;  %437 = vmatpush.msra.mxu0 %v419_v0  ;;  %s2482_s27 = sshll.u32 %s4431_s22, 3  ;;  %v3392_v5 = vld [vmem:[%s4420_s3 + $0x8] sm:$0xff]  ;;  %v3600_v9 = vmov 0.0   ;;  %v3391_v11 = vld [vmem:[%s4420_s3] sm:$0xff]  ;;  %vm467_vm2 = vcmask 261120   ;;  %vm528_vm3 = vcmask 1043456   ;;  %s406_s13 = scalar_lea.vmem %s4429_s12, %s4431_s22 }
   0xd   : > { %s403_s30 = scalar_lea.vmem %s4417_s0, %s2482_s27  ;;  %477 = vmatpush.bf16.msra.mxu1 %v3392_v5  ;;  %v410_v7 = vand.u32 127, %v409_v6  ;;  %v444_v12 = vld [vmem:[%s4419_s2] sm:$0xff]  ;;  %vm510_vm4 = vcmask 64512   ;;  %v3394_v36 = vld [vmem:[%s4422_s5 + $0x8] sm:$0xff]  ;;  %v3603_v51 = vmov 32.0   ;;  %vm2422_vm13 = vcmask 253952  }
   0xe   : > { %438 = vmatpush.msra.mxu0 %v418_v1  ;;  %v408_v3 = vld [vmem:[%s403_s30] sm:$0xff]  ;;  %v2531_v1 = vld [vmem:[%s4423_s6 + $0x88] sm:$0xf]  ;;  %vm2428_vm14 = vcmask 0  }
   0xf   : > { %412 = vperm.xlu0 %3571, %v408_v3   ;;  %v3572_v16 = vld [vmem:[%s4421_s4] ss:$0 sm:$0xff]  ;;  %v3402_v3 = vld [vmem:[%s4423_s6 + $0xc4] sm:$0xf0]  ;;  %v2525_v5 = vld [vmem:[%s4423_s6 + $0xc0] sm:$0xf0] }
  0x10   : > { %439 = vmatpush.msra.mxu0 %v417_v4  ;;  %v3393_v37 = vld [vmem:[%s4422_s5] sm:$0xff]  ;;  %v2532_v6 = vor.u32 %v3402_v3, %v2531_v1  ;;  %v3458_v1 = vld [vmem:[%s4425_s8 + $0x178] sm:$0xff] }
  0x11   : > { %478 = vmatpush.bf16.msra.mxu1 %v3391_v11  ;;  %v3573_v45 = vld [vmem:[%s4428_s11] ss:$0 sm:$0xff]  ;;  %v3399_v4 = vld [vmem:[%s4423_s6 + $0x84] sm:$0xf]  ;;  %v3450_v3 = vld [vmem:[%s4425_s8 + $0x138] sm:$0xff] }
  0x12   : > { %573 = vmatpush.bf16.msrb.mxu0 %v3394_v36  ;;  %v2523_v63 = vld [vmem:[%s4423_s6 + $0x80] sm:$0xf] }
  0x13   : > { %v3401_v0 = vld [vmem:[%s4423_s6 + $0xbc] sm:$0xf0] }
  0x14   : > { %v2524_v2 = vor.u32 %v3401_v0, %v2523_v63  ;;  %v2507_v11 = vld [vmem:[%s4423_s6] sm:$0xf] }
  0x16   : > { %574 = vmatpush.bf16.msrb.mxu0 %v3393_v37 }
  0x81   : > { %v413_v8 = vpop.permute.xlu0 %412 }
  0x82   : > { %vm414_vm1 = vcmp.eq.s32.totalorder %v410_v7, %v413_v8  ;;  %v2528_v7 = vor.u32 %v3399_v4, %v2525_v5  ;;  %v3400_v8 = vld [vmem:[%s4423_s6 + $0x8c] sm:$0xf]  ;;  %v3457_v4 = vld [vmem:[%s4425_s8 + $0x170] sm:$0xff] }
  0x83   : > { %v2483_v10 = vsel %vm414_vm1, 1.0, %v3600_v9  ;;  %v2533_v9 = vld [vmem:[%s4423_s6 + $0xc8] sm:$0xf0]  ;;  %v3473_v5 = vld [vmem:[%s4425_s8 + $0x1f0] sm:$0xff] }
  0x84   : > { %2484 = vmatmul.msk.f32.vlgmr.msra.gmra.mxu0 %vm420_vm0, %v2483_v10  ;;  %v2536_v10 = vor.u32 %v3400_v8, %v2533_v9  ;;  %697 = vmatpush.bf16.msrb.mxu1 %v2528_v7  ;;  %v3465_v7 = vld [vmem:[%s4425_s8 + $0x1b0] sm:$0xff]  ;;  %v3456_v8 = vld [vmem:[%s4425_s8 + $0x168] sm:$0xff] }
  0x85   : > { %v3472_v9 = vld [vmem:[%s4425_s8 + $0x1e8] sm:$0xff] }
  0x86   : > { %723 = vmatpush.bf16.msra.mxu0 %v2536_v10  ;;  %v3448_v10 = vld [vmem:[%s4425_s8 + $0x128] sm:$0xff] }
 0x101   : > { %v441_v13 = vpop.f32.mrf.mxu0 }
 0x102   : > { %v445_v14 = vadd.f32 %v444_v12, %v441_v13  ;;  %v3397_v12 = vld [vmem:[%s4423_s6 + $0x3c] sm:$0xf0]  ;;  %v2515_v13 = vld [vmem:[%s4423_s6 + $0x8] sm:$0xf] }
 0x104   : > { %v446_v15 = vpack.c.bf16 %v445_v14, %v445_v14 }
 0x106   : > { %2493 = vmatmul.msk.bf16.vlgmr.msra.gmra.mxu1 %vm467_vm2, %v446_v15  ;;  %v3398_v15 = vld [vmem:[%s4423_s6 + $0x44] sm:$0xf0] }
 0x183   : > { %v480_v17 = vpop.f32.mrf.mxu1 }
 0x184   : > { %v481_v18 = vadd.f32 %v3572_v16, %v480_v17  ;;  %v3395_v16 = vld [vmem:[%s4423_s6 + $0x4] sm:$0xf] }
 0x185   : > { %v2509_v17 = vld [vmem:[%s4423_s6 + $0x40] sm:$0xf0] }
 0x186   : > { %v484_v19 = vpack.c.bf16 %v481_v18, %v481_v18  ;;  %v2516_v18 = vor.u32 %v3398_v15, %v2515_v13  ;;  %v3471_v13 = vld [vmem:[%s4425_s8 + $0x1e0] sm:$0xff] }
 0x187   : > { %v3463_v15 = vld [vmem:[%s4425_s8 + $0x1a0] sm:$0xff] }
 0x188   : > { %v486_v20 = vunpack.c.l.b16 %v484_v19 }
 0x18a   : > { %v487_v21 = vpack.c.b16 %v486_v20, %v486_v20  ;;  %v3396_v20 = vld [vmem:[%s4423_s6 + $0xc] sm:$0xf] }
 0x18b   : > { %v482_v22 = vpop.f32.mrf.mxu1 }
 0x18c   : > { %523 = vrot.lane.b32.xlu2 %v487_v21, %s3601_s25  ;;  %488 = vrot.lane.b32.xlu0 %v487_v21, %s3602_s26  ;;  %v2517_v21 = vld [vmem:[%s4423_s6 + $0x48] sm:$0xf0] }
 0x18d   : > { %v2520_v22 = vor.u32 %v3396_v20, %v2517_v21  ;;  %v3446_v20 = vld [vmem:[%s4425_s8 + $0x118] sm:$0xff] }
 0x18e   : > { %v3462_v21 = vld [vmem:[%s4425_s8 + $0x198] sm:$0xff] }
 0x18f   : > { %724 = vmatpush.bf16.msra.mxu0 %v2520_v22  ;;  %v3452_v22 = vld [vmem:[%s4425_s8 + $0x148] sm:$0xff] }
 0x1e6   : > { %v524_v23 = vpop.permute.xlu2 %523 }
 0x1e7   : > { %v530_v24 = vsel %vm528_vm3, %v524_v23, 0 }
 0x1e8   : > { %539 = vmatpush.bf16.msra.mxu3 %v530_v24  ;;  %v2568_v24 = vld [vmem:[%s4423_s6 + $0x90] sm:$0xf] }
 0x1ec   : > { %684 = vmatpush.bf16.msrb.mxu3 %v2524_v2  ;;  %v3474_v2 = vld [vmem:[%s4425_s8 + $0x1f8] sm:$0xff] }
 0x1fe   : > { %v489_v25 = vpop.permute.xlu0 %488 }
 0x1ff   : > { %v494_v26 = vsel %vm467_vm2, %v489_v25, 0  ;;  %v3441_v25 = vld [vmem:[%s4423_s6 + $0xcc] sm:$0xf0] }
 0x200   : > { %503 = vmatpush.bf16.xpose.msra.mxu2 %v494_v26  ;;  %v2576_v26 = vld [vmem:[%s4423_s6 + $0x98] sm:$0xf] }
 0x207   : > { %2494 = vmatmul.msk.bf16.vlgmr.msra.gmra.mxu2 %vm467_vm2, %v484_v19  ;;  %v2512_v19 = vor.u32 %v3395_v16, %v2509_v17  ;;  %v3454_v16 = vld [vmem:[%s4425_s8 + $0x158] sm:$0xff] }
 0x208   : > { %710 = vmatpush.bf16.msrb.mxu2 %v2532_v6  ;;  %v3449_v6 = vld [vmem:[%s4425_s8 + $0x130] sm:$0xff]  ;;  %v3470_v17 = vld [vmem:[%s4425_s8 + $0x1d8] sm:$0xff] }
 0x209   : > { %698 = vmatpush.bf16.msrb.mxu1 %v2512_v19  ;;  %v3469_v19 = vld [vmem:[%s4425_s8 + $0x1d0] sm:$0xff] }
 0x20c   : > { %711 = vmatpush.bf16.msrb.mxu2 %v2516_v18  ;;  %v3453_v18 = vld [vmem:[%s4425_s8 + $0x150] sm:$0xff] }
 0x28a   : > { %v505_v27 = vpop.f32.mrf.mxu2 }
 0x28b   : > { %v509_v28 = vmul.f32 0.17677669, %v505_v27 }
 0x28d   : > { %v511_v29 = vsel %vm510_vm4, %v509_v28, -inf }
 0x28e   : > { %512 = vmax.xlane.f32.xlu1 %v511_v29  ;;  %v3442_v29 = vld [vmem:[%s4423_s6 + $0xd4] sm:$0xf0] }
 0x292   : > { %v507_v30 = vpop.f32.mrf.mxu2 }
 0x293   : > { %v2552_v30 = vld [vmem:[%s4423_s6 + $0x10] sm:$0xf] }
 0x301   : > { %v513_v31 = vpop.xlane.xlu1 %512 }
 0x302   : > { %v514_v32 = vsub.f32 %v509_v28, %v513_v31  ;;  %v2569_v28 = vor.u32 %v3441_v25, %v2568_v24  ;;  %v3437_v31 = vld [vmem:[%s4423_s6 + $0x4c] sm:$0xf0] }
 0x303   : > { %v2553_v37 = vor.u32 %v3437_v31, %v2552_v30  ;;  %v3445_v24 = vld [vmem:[%s4425_s8 + $0x110] sm:$0xff]  ;;  %v3444_v30 = vld [vmem:[%s4425_s8 + $0x108] sm:$0xff] }
 0x304   : > { %v515_v33 = vmul.f32 1.442695, %v514_v32  ;;  %v2577_v32 = vor.u32 %v3442_v29, %v2576_v26  ;;  %v3461_v25 = vld [vmem:[%s4425_s8 + $0x190] sm:$0xff]  ;;  %v3451_v26 = vld [vmem:[%s4425_s8 + $0x140] sm:$0xff]  ;;  %v3434_v29 = vld [vmem:[%s4425_s8 + $0xf8] sm:$0xff] }
 0x305   : > { %v3460_v31 = vld [vmem:[%s4425_s8 + $0x188] sm:$0xff] }
 0x306   : > { %3579 = vpow2.f32 %v515_v33  ;;  %v3439_v33 = vld [vmem:[%s4423_s6 + $0x94] sm:$0xf]  ;;  %894 = vmatpush.bf16.msra.mxu2 %v2577_v32 }
 0x307   : > { %v3417_v32 = vld [vmem:[%s4425_s8 + $0x70] sm:$0xff] }
 0x30c   : > { %v3580_v34 = vpop.eup %3579 }
 0x30d   : > { %v517_v35 = vsel %vm510_vm4, %v3580_v34, 0.0 }
 0x30e   : > { %518 = vadd.xlane.f32.xlu1 %v517_v35  ;;  %v3440_v35 = vld [vmem:[%s4423_s6 + $0x9c] sm:$0xf] }
 0x381   : > { %v519_v38 = vpop.xlane.xlu1 %518 }
 0x382   : > { %3581 = vrcp.f32 %v519_v38 }
 0x383   : > { %3583 = vrcp.f32 %v3603_v51 }
 0x388   : > { %v3582_v39 = vpop.eup %3581 }
 0x389   : > { %v521_v40 = vmul.f32 %v3582_v39, %v3580_v34  ;;  %v3584_v52 = vpop.eup %3583  ;;  %v2570_v34 = vld [vmem:[%s4423_s6 + $0xd0] sm:$0xf0]  ;;  %v2578_v39 = vld [vmem:[%s4423_s6 + $0xd8] sm:$0xf0] }
 0x38a   : > { %v587_v53 = vmul.f32 32.0, %v3584_v52  ;;  %vm591_vm5 = vweird.f32 %v3584_v52  ;;  %v2573_v38 = vor.u32 %v3439_v33, %v2570_v34  ;;  %v3433_v33 = vld [vmem:[%s4425_s8 + $0xf0] sm:$0xff]  ;;  %v3443_v34 = vld [vmem:[%s4425_s8 + $0x100] sm:$0xff] }
 0x38b   : > { %v522_v41 = vpack.c.bf16 %v521_v40, %v521_v40  ;;  %v2560_v40 = vld [vmem:[%s4423_s6 + $0x18] sm:$0xf] }
 0x38c   : > { %v588_v54 = vsub.f32 1.0, %v587_v53  ;;  %881 = vmatpush.bf16.msra.mxu1 %v2573_v38  ;;  %v3416_v38 = vld [vmem:[%s4425_s8 + $0x68] sm:$0xff] }
 0x38d   : > { %2495 = vmatmul.msk.bf16.vlgmr.msra.gmra.mxu3 %vm510_vm4, %v522_v41  ;;  %v2581_v41 = vor.u32 %v3440_v35, %v2578_v39  ;;  %v3459_v35 = vld [vmem:[%s4425_s8 + $0x180] sm:$0xff]  ;;  %v3432_v39 = vld [vmem:[%s4425_s8 + $0xe8] sm:$0xff] }
 0x38e   : > { %v589_v55 = vmul.f32 %v3584_v52, %v588_v54 }
 0x390   : > { %v590_v56 = vadd.f32 %v3584_v52, %v589_v55 }
 0x392   : > { %v3722_v57 = vsel %vm591_vm5, %v3584_v52, %v590_v56  ;;  %v3574_v56 = vld [vmem:[%s4428_s11 + $0x1] ss:$0 sm:$0xff] }
 0x410   : > { %v541_v42 = vpop.f32.mrf.mxu3 }
 0x411   : > { %v545_v43 = vpack.c.bf16 %v541_v42, %v541_v42  ;;  %v3438_v42 = vld [vmem:[%s4423_s6 + $0x54] sm:$0xf0] }
 0x413   : > { %2504 = vmatmul.msk.bf16.vlgmr.msrb.gmra.mxu0 %vm467_vm2, %v545_v43  ;;  %v3435_v43 = vld [vmem:[%s4423_s6 + $0x14] sm:$0xf] }
 0x414   : > { %907 = vmatpush.bf16.msrb.mxu0 %v2581_v41  ;;  %v3425_v41 = vld [vmem:[%s4425_s8 + $0xb0] sm:$0xff] }
 0x418   : > { %v543_v44 = vpop.f32.mrf.mxu3 }
 0x419   : > { %v2554_v44 = vld [vmem:[%s4423_s6 + $0x50] sm:$0xf0] }
 0x490   : > { %v576_v46 = vpop.f32.mrf.mxu0 }
 0x491   : > { %v577_v47 = vadd.f32 %v3573_v45, %v576_v46  ;;  %v2561_v45 = vor.u32 %v3438_v42, %v2560_v40  ;;  %v2557_v46 = vor.u32 %v3435_v43, %v2554_v44  ;;  %v3409_v40 = vld [vmem:[%s4425_s8 + $0x30] sm:$0xff]  ;;  %v3415_v42 = vld [vmem:[%s4425_s8 + $0x60] sm:$0xff]  ;;  %v3408_v44 = vld [vmem:[%s4425_s8 + $0x28] sm:$0xff] }
 0x492   : > { %v3431_v43 = vld [vmem:[%s4425_s8 + $0xe0] sm:$0xff] }
 0x493   : > { %v580_v48 = vadd.f32 %v577_v47, %v445_v14  ;;  %v2508_v14 = vor.u32 %v3397_v12, %v2507_v11  ;;  %v3436_v47 = vld [vmem:[%s4423_s6 + $0x1c] sm:$0xf]  ;;  %895 = vmatpush.bf16.msra.mxu2 %v2561_v45  ;;  %882 = vmatpush.bf16.msra.mxu1 %v2557_v46  ;;  %v3464_v11 = vld [vmem:[%s4425_s8 + $0x1a8] sm:$0xff]  ;;  %v3455_v12 = vld [vmem:[%s4425_s8 + $0x160] sm:$0xff] }
 0x494   : > { %v3424_v45 = vld [vmem:[%s4425_s8 + $0xa8] sm:$0xff]  ;;  %v3414_v46 = vld [vmem:[%s4425_s8 + $0x58] sm:$0xff] }
 0x495   : > { %v583_v49 = vsel %vm467_vm2, %v580_v48, 0.0  ;;  %685 = vmatpush.bf16.msrb.mxu3 %v2508_v14  ;;  %v3447_v14 = vld [vmem:[%s4425_s8 + $0x120] sm:$0xff] }
 0x496   : > { %584 = vadd.xlane.f32.xlu2 %v583_v49 }
 0x498   : > { %v578_v50 = vpop.f32.mrf.mxu0 }
 0x499   : > { %868 = vmatpush.bf16.msra.mxu3 %v2569_v28  ;;  %v3418_v28 = vld [vmem:[%s4425_s8 + $0x78] sm:$0xff] }
 0x49d   : > { %869 = vmatpush.bf16.msra.mxu3 %v2553_v37  ;;  %v3426_v37 = vld [vmem:[%s4425_s8 + $0xb8] sm:$0xff] }
 0x509   : > { %v585_v58 = vpop.xlane.xlu2 %584 }
 0x50a   : > { %v593_v59 = vmul.f32 %v3722_v57, %v585_v58 }
 0x50c   : > { %v3725_v60 = vsub.f32 %v580_v48, %v593_v59  ;;  %v2562_v48 = vld [vmem:[%s4423_s6 + $0x58] sm:$0xf0]  ;;  %v3575_v59 = vld [vmem:[%s4428_s11 + $0x2] ss:$0 sm:$0xff] }
 0x50d   : > { %v2565_v49 = vor.u32 %v3436_v47, %v2562_v48  ;;  %v3430_v47 = vld [vmem:[%s4425_s8 + $0xd8] sm:$0xff]  ;;  %v3407_v48 = vld [vmem:[%s4425_s8 + $0x20] sm:$0xff] }
 0x50e   : > { %v595_v61 = vmul.f32 %v3725_v60, %v3725_v60 }
 0x50f   : > { %908 = vmatpush.bf16.msrb.mxu0 %v2565_v49  ;;  %v3423_v49 = vld [vmem:[%s4425_s8 + $0xa0] sm:$0xff] }
 0x510   : > { %v596_v62 = vsel %vm467_vm2, %v595_v61, 0.0 }
 0x511   : > { %597 = vadd.xlane.f32.xlu0 %v596_v62 }
 0x584   : > { %v598_v23 = vpop.xlane.xlu0 %597 }
 0x585   : > { %v599_v27 = vmul.f32 %v598_v23, %v3722_v57  ;;  %v3468_v23 = vld [vmem:[%s4425_s8 + $0x1c8] sm:$0xff] }
 0x587   : > { %v600_v36 = vadd.f32 1e-05, %v599_v27  ;;  %v3467_v27 = vld [vmem:[%s4425_s8 + $0x1c0] sm:$0xff] }
 0x589   : > { %3585 = vrsqrt.f32 %v600_v36  ;;  %vm607_vm7 = vweird.f32 %v600_v36 }
 0x58f   : > { %v3586_v50 = vpop.eup %3585 }
 0x590   : > { %v602_v51 = vmul.f32 %v3586_v50, %v600_v36  ;;  %vm608_vm6 = vweird.f32 %v3586_v50  ;;  %v3410_v36 = vld [vmem:[%s4425_s8 + $0x38] sm:$0xff] }
 0x591   : > { %vm609_vm8 = vmor %vm607_vm7, %vm608_vm6 }
 0x592   : > { %v603_v52 = vmul.f32 %v3586_v50, %v602_v51  ;;  %v3429_v51 = vld [vmem:[%s4425_s8 + $0xd0] sm:$0xff] }
 0x594   : > { %v604_v53 = vmul.f32 0.5, %v603_v52  ;;  %v3406_v52 = vld [vmem:[%s4425_s8 + $0x18] sm:$0xff] }
 0x596   : > { %v605_v54 = vsub.f32 1.5, %v604_v53  ;;  %v3422_v53 = vld [vmem:[%s4425_s8 + $0x98] sm:$0xff] }
 0x598   : > { %v606_v55 = vmul.f32 %v3586_v50, %v605_v54  ;;  %v3412_v54 = vld [vmem:[%s4425_s8 + $0x48] sm:$0xff] }
 0x59a   : > { %v610_v58 = vsel %vm609_vm8, %v3586_v50, %v606_v55  ;;  %v3413_v50 = vld [vmem:[%s4425_s8 + $0x50] sm:$0xff]  ;;  %v3428_v55 = vld [vmem:[%s4425_s8 + $0xc8] sm:$0xff] }
 0x59b   : > { %v611_v61 = vmul.f32 %v610_v58, %v3725_v60  ;;  %v3466_v60 = vld [vmem:[%s4425_s8 + $0x1b8] sm:$0xff] }
 0x59d   : > { %v613_v62 = vmul.f32 %v3574_v56, %v611_v61  ;;  %v3405_v56 = vld [vmem:[%s4425_s8 + $0x10] sm:$0xff] }
 0x59f   : > { %v3834_v63 = vadd.f32 %v3575_v59, %v613_v62  ;;  %v3421_v59 = vld [vmem:[%s4425_s8 + $0x90] sm:$0xff]  ;;  %v3411_v62 = vld [vmem:[%s4425_s8 + $0x40] sm:$0xff] }
 0x5a1   : > { %v3838_v0 = vpack.c.bf16 %v3834_v63, %v3834_v63 }
 0x5a3   : > { %2537 = vmatmul.msk.bf16.vlgmr.msrb.gmra.mxu3 %vm467_vm2, %v3838_v0  ;;  %2538 = vmatmul.msk.bf16.vlgmr.msrb.gmra.mxu1 %vm467_vm2, %v3838_v0 }
 0x5a4   : > { %2539 = vmatmul.msk.bf16.vlgmr.msrb.gmra.mxu2 %vm467_vm2, %v3838_v0  ;;  %2540 = vmatmul.msk.bf16.vlgmr.msra.gmra.mxu0 %vm467_vm2, %v3838_v0 }
 0x5a5   : > { %1192 = vmatpush.bf16.msrb.mxu1 %v3458_v1  ;;  %1218 = vmatpush.bf16.msra.mxu0 %v3474_v2  ;;  %v3427_v1 = vld [vmem:[%s4425_s8 + $0xc0] sm:$0xff]  ;;  %v3404_v2 = vld [vmem:[%s4425_s8 + $0x8] sm:$0xff] }
 0x5a6   : > { %1179 = vmatpush.bf16.msrb.mxu3 %v3450_v3  ;;  %1205 = vmatpush.bf16.msrb.mxu2 %v3466_v60  ;;  %v3420_v3 = vld [vmem:[%s4425_s8 + $0x88] sm:$0xff] }
 0x5a9   : > { %1193 = vmatpush.bf16.msrb.mxu1 %v3457_v4  ;;  %1219 = vmatpush.bf16.msra.mxu0 %v3473_v5 }
 0x5aa   : > { %1180 = vmatpush.bf16.msrb.mxu3 %v3449_v6  ;;  %1206 = vmatpush.bf16.msrb.mxu2 %v3465_v7  ;;  %v3403_v6 = vld [vmem:[%s4425_s8] sm:$0xff] }
 0x5ab   : > { %v3419_v7 = vld [vmem:[%s4425_s8 + $0x80] sm:$0xff] }
 0x5ad   : > { %1194 = vmatpush.bf16.msrb.mxu1 %v3456_v8  ;;  %1220 = vmatpush.bf16.msra.mxu0 %v3472_v9  ;;  %v2549_v9 = vld [vmem:[%s4424_s7 + $0x4] sm:$0xf] }
 0x5ae   : > { %1181 = vmatpush.bf16.msrb.mxu3 %v3448_v10  ;;  %1207 = vmatpush.bf16.msrb.mxu2 %v3464_v11  ;;  %v815_v10 = vperm.slane %v2549_v9, 1 }
 0x5b1   : > { %1195 = vmatpush.bf16.msrb.mxu1 %v3455_v12  ;;  %1221 = vmatpush.bf16.msra.mxu0 %v3471_v13  ;;  %v817_v12 = vperm.slane %v2549_v9, 3 }
 0x5b2   : > { %1182 = vmatpush.bf16.msrb.mxu3 %v3447_v14  ;;  %1208 = vmatpush.bf16.msrb.mxu2 %v3463_v15 }
 0x5b3   : > { %2582 = vmatmul.msk.bf16.vlgmr.msra.gmra.mxu3 %vm467_vm2, %v3838_v0  ;;  %2583 = vmatmul.msk.bf16.vlgmr.msra.gmra.mxu1 %vm467_vm2, %v3838_v0 }
 0x5b4   : > { %2584 = vmatmul.msk.bf16.vlgmr.msra.gmra.mxu2 %vm467_vm2, %v3838_v0  ;;  %2585 = vmatmul.msk.bf16.vlgmr.msrb.gmra.mxu0 %vm467_vm2, %v3838_v0 }
 0x5b5   : > { %1196 = vmatpush.bf16.msrb.mxu1 %v3454_v16  ;;  %1222 = vmatpush.bf16.msra.mxu0 %v3470_v17  ;;  %v3479_v17 = vld [vmem:[%s4423_s6 + $0xa4] sm:$0xf] }
 0x5b6   : > { %1183 = vmatpush.bf16.msrb.mxu3 %v3446_v20  ;;  %1209 = vmatpush.bf16.msrb.mxu2 %v3462_v21  ;;  %v3480_v20 = vld [vmem:[%s4423_s6 + $0xac] sm:$0xf] }
 0x5b7   : > { %v2943_v21 = vld [vmem:[%s4423_s6 + $0xe8] sm:$0xf0] }
 0x5b9   : > { %1197 = vmatpush.bf16.msrb.mxu1 %v3453_v18  ;;  %1223 = vmatpush.bf16.msra.mxu0 %v3469_v19  ;;  %v2935_v18 = vld [vmem:[%s4423_s6 + $0xe0] sm:$0xf0] }
 0x5ba   : > { %1184 = vmatpush.bf16.msrb.mxu3 %v3445_v24  ;;  %1210 = vmatpush.bf16.msrb.mxu2 %v3461_v25  ;;  %v816_v25 = vperm.slane %v2549_v9, 2 }
 0x5bd   : > { %1198 = vmatpush.bf16.msrb.mxu1 %v3452_v22  ;;  %1224 = vmatpush.bf16.msra.mxu0 %v3468_v23  ;;  %v814_v23 = vperm.slane %v2549_v9, 0 }
 0x5be   : > { %1185 = vmatpush.bf16.msrb.mxu3 %v3444_v30  ;;  %1211 = vmatpush.bf16.msrb.mxu2 %v3460_v31  ;;  %v2919_v30 = vld [vmem:[%s4423_s6 + $0x60] sm:$0xf0]  ;;  %v625_v31 = vld [vmem:[%s4424_s7] sm:$0xf] }
 0x5bf   : > { %v629_v9 = vperm.slane %v625_v31, 2 }
 0x5c1   : > { %1199 = vmatpush.bf16.msrb.mxu1 %v3451_v26  ;;  %1225 = vmatpush.bf16.msra.mxu0 %v3467_v27  ;;  %v2938_v26 = vor.u32 %v3479_v17, %v2935_v18  ;;  %v3497_v18 = vld [vmem:[%s4425_s8 + $0x270] sm:$0xff] }
 0x5c2   : > { %1186 = vmatpush.bf16.msrb.mxu3 %v3443_v34  ;;  %1212 = vmatpush.bf16.msrb.mxu2 %v3459_v35  ;;  %v3476_v34 = vld [vmem:[%s4423_s6 + $0x2c] sm:$0xf] }
 0x5c3   : > { %v2927_v35 = vld [vmem:[%s4423_s6 + $0x68] sm:$0xf0] }
 0x5c5   : > { %1436 = vmatpush.bf16.msra.mxu1 %v3418_v28  ;;  %1462 = vmatpush.bf16.msrb.mxu0 %v3434_v29  ;;  %v2946_v28 = vor.u32 %v3480_v20, %v2943_v21  ;;  %v3475_v29 = vld [vmem:[%s4423_s6 + $0x24] sm:$0xf]  ;;  %v3496_v20 = vld [vmem:[%s4425_s8 + $0x268] sm:$0xff] }
 0x5c6   : > { %1423 = vmatpush.bf16.msra.mxu3 %v3410_v36  ;;  %1449 = vmatpush.bf16.msra.mxu2 %v3426_v37  ;;  %v3512_v21 = vld [vmem:[%s4425_s8 + $0x2e8] sm:$0xff] }
 0x5c9   : > { %1437 = vmatpush.bf16.msra.mxu1 %v3417_v32  ;;  %1463 = vmatpush.bf16.msrb.mxu0 %v3433_v33 }
 0x5ca   : > { %1424 = vmatpush.bf16.msra.mxu3 %v3409_v40  ;;  %1450 = vmatpush.bf16.msra.mxu2 %v3425_v41 }
 0x5cd   : > { %1438 = vmatpush.bf16.msra.mxu1 %v3416_v38  ;;  %1464 = vmatpush.bf16.msrb.mxu0 %v3432_v39  ;;  %v2933_v38 = vld [vmem:[%s4423_s6 + $0xa0] sm:$0xf] }
 0x5ce   : > { %1425 = vmatpush.bf16.msra.mxu3 %v3408_v44  ;;  %1451 = vmatpush.bf16.msra.mxu2 %v3424_v45  ;;  %v3481_v39 = vld [vmem:[%s4423_s6 + $0xdc] sm:$0xf0]  ;;  %v2922_v44 = vor.u32 %v3475_v29, %v2919_v30  ;;  %v628_v45 = vperm.slane %v625_v31, 1  ;;  %v3510_v29 = vld [vmem:[%s4425_s8 + $0x2d8] sm:$0xff]  ;;  %v3488_v30 = vld [vmem:[%s4425_s8 + $0x228] sm:$0xff] }
 0x5d1   : > { %1439 = vmatpush.bf16.msra.mxu1 %v3415_v42  ;;  %1465 = vmatpush.bf16.msrb.mxu0 %v3431_v43  ;;  %v2941_v42 = vld [vmem:[%s4423_s6 + $0xa8] sm:$0xf] }
 0x5d2   : > { %1426 = vmatpush.bf16.msra.mxu3 %v3407_v48  ;;  %1452 = vmatpush.bf16.msra.mxu2 %v3423_v49  ;;  %v3482_v43 = vld [vmem:[%s4423_s6 + $0xe4] sm:$0xf0]  ;;  %v2930_v48 = vor.u32 %v3476_v34, %v2927_v35  ;;  %v630_v49 = vperm.slane %v625_v31, 3  ;;  %v3487_v34 = vld [vmem:[%s4425_s8 + $0x220] sm:$0xff] }
 0x5d3   : > { %v3492_v35 = vld [vmem:[%s4425_s8 + $0x248] sm:$0xff] }
 0x5d5   : > { %1440 = vmatpush.bf16.msra.mxu1 %v3414_v46  ;;  %1466 = vmatpush.bf16.msrb.mxu0 %v3430_v47 }
 0x5d6   : > { %1427 = vmatpush.bf16.msra.mxu3 %v3406_v52  ;;  %1453 = vmatpush.bf16.msra.mxu2 %v3422_v53  ;;  %v2942_v53 = vor.u32 %v3482_v43, %v2941_v42  ;;  %v3502_v42 = vld [vmem:[%s4425_s8 + $0x298] sm:$0xff]  ;;  %v3507_v43 = vld [vmem:[%s4425_s8 + $0x2c0] sm:$0xff] }
 0x5d9   : > { %1441 = vmatpush.bf16.msra.mxu1 %v3413_v50  ;;  %1467 = vmatpush.bf16.msrb.mxu0 %v3429_v51  ;;  %v2934_v51 = vor.u32 %v3481_v39, %v2933_v38  ;;  %v3508_v38 = vld [vmem:[%s4425_s8 + $0x2c8] sm:$0xff] }
 0x5da   : > { %1428 = vmatpush.bf16.msra.mxu3 %v3405_v56  ;;  %1454 = vmatpush.bf16.msra.mxu2 %v3421_v59  ;;  %v2925_v59 = vld [vmem:[%s4423_s6 + $0x28] sm:$0xf] }
 0x5dd   : > { %1442 = vmatpush.bf16.msra.mxu1 %v3412_v54  ;;  %1468 = vmatpush.bf16.msrb.mxu0 %v3428_v55  ;;  %v2917_v54 = vld [vmem:[%s4423_s6 + $0x20] sm:$0xf] }
 0x5de   : > { %1429 = vmatpush.bf16.msra.mxu3 %v3404_v2  ;;  %1455 = vmatpush.bf16.msra.mxu2 %v3420_v3  ;;  %v3477_v55 = vld [vmem:[%s4423_s6 + $0x5c] sm:$0xf0] }
 0x5e1   : > { %1443 = vmatpush.bf16.msra.mxu1 %v3411_v62  ;;  %1469 = vmatpush.bf16.msrb.mxu0 %v3427_v1  ;;  %v3478_v62 = vld [vmem:[%s4423_s6 + $0x64] sm:$0xf0] }
 0x5e2   : > { %1430 = vmatpush.bf16.msra.mxu3 %v3403_v6  ;;  %1456 = vmatpush.bf16.msra.mxu2 %v3419_v7  ;;  %v627_v6 = vperm.slane %v625_v31, 0  ;;  %v3493_v31 = vld [vmem:[%s4425_s8 + $0x250] sm:$0xff] }
 0x620   : > { %v4027_v58 = vpop.f32.mrf.mxu1 }
 0x621   : > { %v4032_v61 = vpop.f32.mrf.mxu0  ;;  %v701_v1 = vadd.f32 %v4027_v58, %v628_v45  ;;  %v3501_v45 = vld [vmem:[%s4425_s8 + $0x290] sm:$0xff] }
 0x622   : > { %v727_v2 = vadd.f32 %v4032_v61, %v630_v49  ;;  %v3500_v49 = vld [vmem:[%s4425_s8 + $0x288] sm:$0xff] }
 0x626   : > { %v4046_v60 = vpop.f32.mrf.mxu3 }
 0x627   : > { %v4048_v4 = vpop.f32.mrf.mxu2 }
 0x628   : > { %v702_v5 = vpop.f32.mrf.mxu1  ;;  %v714_v58 = vadd.f32 %v4048_v4, %v629_v9  ;;  %v3514_v4 = vld [vmem:[%s4425_s8 + $0x2f8] sm:$0xff]  ;;  %v3156_v9 = vld [vmem:[%s4423_s6 + $0x70] sm:$0xf0] }
 0x629   : > { %v728_v8 = vpop.f32.mrf.mxu0  ;;  %v2918_v5 = vor.u32 %v3477_v55, %v2917_v54  ;;  %v3172_v54 = vld [vmem:[%s4423_s6 + $0xf0] sm:$0xf0]  ;;  %v3520_v55 = vld [vmem:[%s4423_s6 + $0xbc] sm:$0xf] }
 0x62a   : > { %v2926_v8 = vor.u32 %v3478_v62, %v2925_v59  ;;  %v3483_v59 = vld [vmem:[%s4425_s8 + $0x200] sm:$0xff] }
 0x62b   : > { %v3499_v62 = vld [vmem:[%s4425_s8 + $0x280] sm:$0xff] }
 0x62e   : > { %v689_v11 = vpop.f32.mrf.mxu3 }
 0x62f   : > { %v715_v13 = vpop.f32.mrf.mxu2  ;;  %v733_v11 = vmax.f32 %v727_v2, 0.0  ;;  %v3180_v2 = vld [vmem:[%s4423_s6 + $0xf8] sm:$0xf0] }
 0x630   : > { %v884_v14 = vpop.f32.mrf.mxu1 }
 0x631   : > { %v885_v15 = vadd.f32 %v884_v14, %v815_v10  ;;  %v910_v16 = vpop.f32.mrf.mxu0  ;;  %v731_v10 = vmax.f32 %v701_v1, 0.0  ;;  %v737_v14 = vpack.c.bf16 %v733_v11, %v733_v11 }
 0x632   : > { %v911_v19 = vadd.f32 %v910_v16, %v817_v12  ;;  %v688_v12 = vadd.f32 %v4046_v60, %v627_v6  ;;  %v3498_v60 = vld [vmem:[%s4425_s8 + $0x278] sm:$0xff] }
 0x633   : > { %v915_v22 = vmax.f32 %v885_v15, 0.0  ;;  %v735_v13 = vpack.c.bf16 %v731_v10, %v731_v10  ;;  %v732_v15 = vmax.f32 %v714_v58, 0.0  ;;  %v3516_v10 = vld [vmem:[%s4423_s6 + $0x3c] sm:$0xf] }
 0x634   : > { %v917_v24 = vmax.f32 %v911_v19, 0.0  ;;  %v730_v61 = vmax.f32 %v688_v12, 0.0  ;;  %v3513_v19 = vld [vmem:[%s4425_s8 + $0x2f0] sm:$0xff]  ;;  %v3164_v12 = vld [vmem:[%s4423_s6 + $0x78] sm:$0xf0] }
 0x635   : > { %v919_v27 = vpack.c.bf16 %v915_v22, %v915_v22  ;;  %v736_v17 = vpack.c.bf16 %v732_v15, %v732_v15  ;;  %v3490_v22 = vld [vmem:[%s4425_s8 + $0x238] sm:$0xff] }
 0x636   : > { %v921_v32 = vpack.c.bf16 %v917_v24, %v917_v24  ;;  %v871_v33 = vpop.f32.mrf.mxu3  ;;  %v734_v16 = vpack.c.bf16 %v730_v61, %v730_v61  ;;  %v3506_v24 = vld [vmem:[%s4425_s8 + $0x2b8] sm:$0xff]  ;;  %v3167_v61 = vor.u32 %v3516_v10, %v3164_v12 }
 0x637   : > { %v872_v36 = vadd.f32 %v871_v33, %v814_v23  ;;  %v897_v37 = vpop.f32.mrf.mxu2  ;;  %1200 = vmatmul.bf16.vlgmr.msrb.gmra.mxu1 %v919_v27  ;;  %v3495_v23 = vld [vmem:[%s4425_s8 + $0x260] sm:$0xff]  ;;  %v3494_v27 = vld [vmem:[%s4425_s8 + $0x258] sm:$0xff]  ;;  %v3509_v33 = vld [vmem:[%s4425_s8 + $0x2d0] sm:$0xff] }
 0x638   : > { %v898_v40 = vadd.f32 %v897_v37, %v816_v25  ;;  %1226 = vmatmul.bf16.vlgmr.msra.gmra.mxu0 %v921_v32  ;;  %v886_v41 = vpop.f32.mrf.mxu1  ;;  %1554 = vmatpush.bf16.msrb.mxu1 %v2938_v26  ;;  %v3511_v25 = vld [vmem:[%s4425_s8 + $0x2e0] sm:$0xff]  ;;  %v3489_v26 = vld [vmem:[%s4425_s8 + $0x230] sm:$0xff]  ;;  %v3504_v32 = vld [vmem:[%s4425_s8 + $0x2a8] sm:$0xff] }
 0x639   : > { %v914_v46 = vmax.f32 %v872_v36, 0.0  ;;  %v912_v47 = vpop.f32.mrf.mxu0  ;;  %1580 = vmatpush.bf16.msra.mxu0 %v2946_v28  ;;  %v3505_v28 = vld [vmem:[%s4425_s8 + $0x2b0] sm:$0xff]  ;;  %v3503_v37 = vld [vmem:[%s4425_s8 + $0x2a0] sm:$0xff]  ;;  %v3550_v10 = vld [vmem:[%s4425_s8 + $0x3d8] sm:$0xff] }
 0x63a   : > { %v916_v50 = vmax.f32 %v898_v40, 0.0  ;;  %v3486_v40 = vld [vmem:[%s4425_s8 + $0x218] sm:$0xff]  ;;  %v3491_v41 = vld [vmem:[%s4425_s8 + $0x240] sm:$0xff] }
 0x63b   : > { %v918_v52 = vpack.c.bf16 %v914_v46, %v914_v46  ;;  %v3546_v12 = vld [vmem:[%s4425_s8 + $0x3b8] sm:$0xff] }
 0x63c   : > { %v920_v56 = vpack.c.bf16 %v916_v50, %v916_v50  ;;  %1555 = vmatpush.bf16.msrb.mxu1 %v2922_v44  ;;  %v3485_v44 = vld [vmem:[%s4425_s8 + $0x210] sm:$0xff] }
 0x63d   : > { %1187 = vmatmul.bf16.vlgmr.msrb.gmra.mxu3 %v918_v52  ;;  %1581 = vmatpush.bf16.msra.mxu0 %v2930_v48  ;;  %v3484_v48 = vld [vmem:[%s4425_s8 + $0x208] sm:$0xff] }
 0x63e   : > { %1213 = vmatmul.bf16.vlgmr.msrb.gmra.mxu2 %v920_v56  ;;  %v873_v3 = vpop.f32.mrf.mxu3  ;;  %1541 = vmatpush.bf16.msrb.mxu3 %v2934_v51 }
 0x63f   : > { %v899_v7 = vpop.f32.mrf.mxu2  ;;  %1567 = vmatpush.bf16.msrb.mxu2 %v2942_v53  ;;  %v3519_v53 = vld [vmem:[%s4423_s6 + $0xb4] sm:$0xf] }
 0x640   : > { %v3175_v1 = vor.u32 %v3519_v53, %v3172_v54 }
 0x642   : > { %1542 = vmatpush.bf16.msrb.mxu3 %v2918_v5  ;;  %v3183_v5 = vor.u32 %v3520_v55, %v3180_v2 }
 0x643   : > { %1568 = vmatpush.bf16.msrb.mxu2 %v2926_v8  ;;  %v3515_v8 = vld [vmem:[%s4423_s6 + $0x34] sm:$0xf] }
 0x644   : > { %v3159_v11 = vor.u32 %v3515_v8, %v3156_v9  ;;  %v3535_v8 = vld [vmem:[%s4425_s8 + $0x360] sm:$0xff] }
 0x645   : > { %v3551_v9 = vld [vmem:[%s4425_s8 + $0x3e0] sm:$0xff] }
 0x647   : > { %1444 = vmatmul.bf16.vlgmr.msra.gmra.mxu1 %v735_v13  ;;  %v3170_v13 = vld [vmem:[%s4423_s6 + $0xb0] sm:$0xf] }
 0x648   : > { %1470 = vmatmul.bf16.vlgmr.msrb.gmra.mxu0 %v737_v14  ;;  %1865 = vmatpush.bf16.msra.mxu1 %v3498_v60  ;;  %v3521_v14 = vld [vmem:[%s4423_s6 + $0xec] sm:$0xf0]  ;;  %v3522_v60 = vld [vmem:[%s4423_s6 + $0xf4] sm:$0xf0] }
 0x649   : > { %1891 = vmatpush.bf16.msrb.mxu0 %v3514_v4 }
 0x64c   : > { %1866 = vmatpush.bf16.msra.mxu1 %v3497_v18 }
 0x64d   : > { %1431 = vmatmul.bf16.vlgmr.msra.gmra.mxu3 %v734_v16  ;;  %1892 = vmatpush.bf16.msrb.mxu0 %v3513_v19  ;;  %v3171_v16 = vor.u32 %v3521_v14, %v3170_v13  ;;  %v3154_v19 = vld [vmem:[%s4423_s6 + $0x30] sm:$0xf] }
 0x64e   : > { %1457 = vmatmul.bf16.vlgmr.msra.gmra.mxu2 %v736_v17  ;;  %1852 = vmatpush.bf16.msra.mxu3 %v3490_v22  ;;  %v3178_v17 = vld [vmem:[%s4423_s6 + $0xb8] sm:$0xf]  ;;  %v3549_v13 = vld [vmem:[%s4425_s8 + $0x3d0] sm:$0xff] }
 0x64f   : > { %1878 = vmatpush.bf16.msra.mxu2 %v3506_v24  ;;  %v3179_v4 = vor.u32 %v3522_v60, %v3178_v17  ;;  %v3518_v24 = vld [vmem:[%s4423_s6 + $0x74] sm:$0xf0]  ;;  %v3529_v14 = vld [vmem:[%s4425_s8 + $0x330] sm:$0xff]  ;;  %v3528_v17 = vld [vmem:[%s4425_s8 + $0x328] sm:$0xff] }
 0x650   : > { %1867 = vmatpush.bf16.msra.mxu1 %v3496_v20  ;;  %v3517_v20 = vld [vmem:[%s4423_s6 + $0x6c] sm:$0xf0]  ;;  %v3544_v60 = vld [vmem:[%s4425_s8 + $0x3a8] sm:$0xff] }
 0x651   : > { %1893 = vmatpush.bf16.msrb.mxu0 %v3512_v21  ;;  %v3162_v21 = vld [vmem:[%s4423_s6 + $0x38] sm:$0xf] }
 0x652   : > { %1853 = vmatpush.bf16.msra.mxu3 %v3489_v26  ;;  %v3163_v26 = vor.u32 %v3518_v24, %v3162_v21  ;;  %v3526_v21 = vld [vmem:[%s4425_s8 + $0x318] sm:$0xff]  ;;  %v3541_v24 = vld [vmem:[%s4425_s8 + $0x390] sm:$0xff] }
 0x653   : > { %1879 = vmatpush.bf16.msra.mxu2 %v3505_v28 }
 0x654   : > { %1868 = vmatpush.bf16.msra.mxu1 %v3495_v23  ;;  %v3155_v23 = vor.u32 %v3517_v20, %v3154_v19  ;;  %v3527_v19 = vld [vmem:[%s4425_s8 + $0x320] sm:$0xff] }
 0x655   : > { %1894 = vmatpush.bf16.msrb.mxu0 %v3511_v25  ;;  %v2914_v25 = vld [vmem:[%s4424_s7 + $0x8] sm:$0xf]  ;;  %v3543_v20 = vld [vmem:[%s4425_s8 + $0x3a0] sm:$0xff] }
 0x656   : > { %1854 = vmatpush.bf16.msra.mxu3 %v3488_v30  ;;  %v1488_v30 = vperm.slane %v2914_v25, 1 }
 0x657   : > { %2948 = vmatmul.msk.bf16.vlgmr.msrb.gmra.mxu1 %vm467_vm2, %v3838_v0  ;;  %1880 = vmatpush.bf16.msra.mxu2 %v3504_v32 }
 0x658   : > { %2950 = vmatmul.msk.bf16.vlgmr.msra.gmra.mxu0 %vm467_vm2, %v3838_v0  ;;  %1869 = vmatpush.bf16.msra.mxu1 %v3494_v27 }
 0x659   : > { %1895 = vmatpush.bf16.msrb.mxu0 %v3510_v29 }
 0x65a   : > { %1855 = vmatpush.bf16.msra.mxu3 %v3487_v34 }
 0x65b   : > { %1881 = vmatpush.bf16.msra.mxu2 %v3503_v37 }
 0x65c   : > { %1870 = vmatpush.bf16.msra.mxu1 %v3493_v31  ;;  %v1490_v31 = vperm.slane %v2914_v25, 3 }
 0x65d   : > { %2947 = vmatmul.msk.bf16.vlgmr.msrb.gmra.mxu3 %vm467_vm2, %v3838_v0  ;;  %1896 = vmatpush.bf16.msrb.mxu0 %v3509_v33 }
 0x65e   : > { %2949 = vmatmul.msk.bf16.vlgmr.msrb.gmra.mxu2 %vm467_vm2, %v3838_v0  ;;  %1856 = vmatpush.bf16.msra.mxu3 %v3486_v40 }
 0x65f   : > { %1882 = vmatpush.bf16.msra.mxu2 %v3502_v42  ;;  %v3538_v42 = vld [vmem:[%s4425_s8 + $0x378] sm:$0xff] }
 0x660   : > { %1871 = vmatpush.bf16.msra.mxu1 %v3492_v35 }
 0x661   : > { %1897 = vmatpush.bf16.msrb.mxu0 %v3508_v38 }
 0x662   : > { %1857 = vmatpush.bf16.msra.mxu3 %v3485_v44 }
 0x663   : > { %1883 = vmatpush.bf16.msra.mxu2 %v3501_v45  ;;  %v3554_v45 = vld [vmem:[%s4425_s8 + $0x3f8] sm:$0xff] }
 0x664   : > { %1872 = vmatpush.bf16.msra.mxu1 %v3491_v41 }
 0x665   : > { %1898 = vmatpush.bf16.msrb.mxu0 %v3507_v43 }
 0x666   : > { %1858 = vmatpush.bf16.msra.mxu3 %v3484_v48  ;;  %v3537_v48 = vld [vmem:[%s4425_s8 + $0x370] sm:$0xff] }
 0x667   : > { %1884 = vmatpush.bf16.msra.mxu2 %v3500_v49 }
 0x668   : > { %1984 = vmatpush.bf16.msrb.mxu1 %v3175_v1 }
 0x669   : > { %2010 = vmatpush.bf16.msra.mxu0 %v3183_v5 }
 0x66a   : > { %1859 = vmatpush.bf16.msra.mxu3 %v3483_v59 }
 0x66b   : > { %1885 = vmatpush.bf16.msra.mxu2 %v3499_v62 }
 0x66c   : > { %1985 = vmatpush.bf16.msrb.mxu1 %v3159_v11  ;;  %v3530_v11 = vld [vmem:[%s4425_s8 + $0x338] sm:$0xff] }
 0x66d   : > { %2011 = vmatpush.bf16.msra.mxu0 %v3167_v61  ;;  %v3545_v61 = vld [vmem:[%s4425_s8 + $0x3b0] sm:$0xff] }
 0x66e   : > { %1971 = vmatpush.bf16.msrb.mxu3 %v3171_v16  ;;  %v3548_v16 = vld [vmem:[%s4425_s8 + $0x3c8] sm:$0xff] }
 0x66f   : > { %1997 = vmatpush.bf16.msrb.mxu2 %v3179_v4  ;;  %v3531_v4 = vld [vmem:[%s4425_s8 + $0x340] sm:$0xff] }
 0x672   : > { %1972 = vmatpush.bf16.msrb.mxu3 %v3155_v23  ;;  %v3525_v23 = vld [vmem:[%s4425_s8 + $0x310] sm:$0xff] }
 0x673   : > { %1998 = vmatpush.bf16.msrb.mxu2 %v3163_v26 }
 0x6b4   : > { %v1201_v36 = vpop.f32.mrf.mxu1 }
 0x6b5   : > { %v1227_v39 = vpop.f32.mrf.mxu0 }
 0x6bc   : > { %v1203_v46 = vpop.f32.mrf.mxu1 }
 0x6bd   : > { %v1229_v47 = vpop.f32.mrf.mxu0 }
 0x6c0   : > { %v1188_v50 = vpop.f32.mrf.mxu3 }
 0x6c1   : > { %v1202_v51 = vadd.f32 %v1201_v36, %v1188_v50  ;;  %v1214_v52 = vpop.f32.mrf.mxu2  ;;  %v1487_v50 = vperm.slane %v2914_v25, 0 }
 0x6c3   : > { %v1215_v56 = vadd.f32 %v1214_v52, %v1202_v51  ;;  %v3553_v51 = vld [vmem:[%s4425_s8 + $0x3f0] sm:$0xff]  ;;  %v1489_v52 = vperm.slane %v2914_v25, 2 }
 0x6c4   : > { %v1445_v3 = vpop.f32.mrf.mxu1 }
 0x6c5   : > { %v1471_v6 = vpop.f32.mrf.mxu0  ;;  %v1228_v7 = vadd.f32 %v1227_v39, %v1215_v56 }
 0x6c8   : > { %v1190_v58 = vpop.f32.mrf.mxu3 }
 0x6c9   : > { %v1216_v15 = vpop.f32.mrf.mxu2  ;;  %v3533_v58 = vld [vmem:[%s4425_s8 + $0x350] sm:$0xff] }
 0x6ca   : > { %v3532_v15 = vld [vmem:[%s4425_s8 + $0x348] sm:$0xff] }
 0x6cc   : > { %v1447_v18 = vpop.f32.mrf.mxu1 }
 0x6cd   : > { %v1473_v22 = vpop.f32.mrf.mxu0  ;;  %v3547_v18 = vld [vmem:[%s4425_s8 + $0x3c0] sm:$0xff] }
 0x6ce   : > { %v3542_v22 = vld [vmem:[%s4425_s8 + $0x398] sm:$0xff] }
 0x6d0   : > { %v1432_v27 = vpop.f32.mrf.mxu3 }
 0x6d1   : > { %v1433_v28 = vadd.f32 %v1432_v27, %v1228_v7  ;;  %v1458_v29 = vpop.f32.mrf.mxu2  ;;  %v3552_v7 = vld [vmem:[%s4425_s8 + $0x3e8] sm:$0xff] }
 0x6d2   : > { %v3524_v27 = vld [vmem:[%s4425_s8 + $0x308] sm:$0xff] }
 0x6d3   : > { %v1446_v32 = vadd.f32 %v1445_v3, %v1433_v28  ;;  %v3540_v28 = vld [vmem:[%s4425_s8 + $0x388] sm:$0xff] }
 0x6d4   : > { %v1557_v33 = vpop.f32.mrf.mxu1 }
 0x6d5   : > { %v1459_v34 = vadd.f32 %v1458_v29, %v1446_v32  ;;  %v1558_v35 = vadd.f32 %v1557_v33, %v1488_v30  ;;  %v1583_v36 = vpop.f32.mrf.mxu0  ;;  %v3523_v29 = vld [vmem:[%s4425_s8 + $0x300] sm:$0xff]  ;;  %v3151_v33 = vld [vmem:[%s4424_s7 + $0xc] sm:$0xf] }
 0x6d6   : > { %v1584_v37 = vadd.f32 %v1583_v36, %v1490_v31  ;;  %v3539_v30 = vld [vmem:[%s4425_s8 + $0x380] sm:$0xff] }
 0x6d7   : > { %v4269_v38 = vadd.f32 %v1471_v6, %v1459_v34  ;;  %v1588_v39 = vmax.f32 %v1558_v35, 0.0  ;;  %v3536_v6 = vld [vmem:[%s4425_s8 + $0x368] sm:$0xff]  ;;  %v1918_v34 = vperm.slane %v3151_v33, 1  ;;  %v1920_v35 = vperm.slane %v3151_v33, 3 }
 0x6d8   : > { %v1590_v40 = vmax.f32 %v1584_v37, 0.0  ;;  %v1434_v41 = vpop.f32.mrf.mxu3 }
 0x6d9   : > { %v1592_v43 = vpack.c.bf16 %v1588_v39, %v1588_v39  ;;  %v1460_v44 = vpop.f32.mrf.mxu2 }
 0x6da   : > { %v1594_v46 = vpack.c.bf16 %v1590_v40, %v1590_v40 }
 0x6db   : > { %1873 = vmatmul.bf16.vlgmr.msra.gmra.mxu1 %v1592_v43 }
 0x6dc   : > { %1899 = vmatmul.bf16.vlgmr.msrb.gmra.mxu0 %v1594_v46  ;;  %v1559_v47 = vpop.f32.mrf.mxu1  ;;  %2295 = vmatpush.bf16.msra.mxu1 %v3538_v42 }
 0x6dd   : > { %v1585_v49 = vpop.f32.mrf.mxu0  ;;  %2321 = vmatpush.bf16.msrb.mxu0 %v3554_v45 }
 0x6e0   : > { %v1544_v53 = vpop.f32.mrf.mxu3  ;;  %2296 = vmatpush.bf16.msra.mxu1 %v3537_v48 }
 0x6e1   : > { %v1545_v54 = vadd.f32 %v1544_v53, %v1487_v50  ;;  %v1570_v55 = vpop.f32.mrf.mxu2  ;;  %2322 = vmatpush.bf16.msrb.mxu0 %v3553_v51 }
 0x6e2   : > { %v1571_v56 = vadd.f32 %v1570_v55, %v1489_v52  ;;  %v1917_v55 = vperm.slane %v3151_v33, 0 }
 0x6e3   : > { %v1587_v59 = vmax.f32 %v1545_v54, 0.0 }
 0x6e4   : > { %v1589_v62 = vmax.f32 %v1571_v56, 0.0  ;;  %2297 = vmatpush.bf16.msra.mxu1 %v3536_v6  ;;  %v1919_v56 = vperm.slane %v3151_v33, 2 }
 0x6e5   : > { %v1591_v1 = vpack.c.bf16 %v1587_v59, %v1587_v59  ;;  %2323 = vmatpush.bf16.msrb.mxu0 %v3552_v7 }
 0x6e6   : > { %v1593_v2 = vpack.c.bf16 %v1589_v62, %v1589_v62 }
 0x6e7   : > { %1860 = vmatmul.bf16.vlgmr.msra.gmra.mxu3 %v1591_v1 }
 0x6e8   : > { %1886 = vmatmul.bf16.vlgmr.msra.gmra.mxu2 %v1593_v2  ;;  %v1546_v3 = vpop.f32.mrf.mxu3  ;;  %2298 = vmatpush.bf16.msra.mxu1 %v3535_v8 }
 0x6e9   : > { %v1572_v5 = vpop.f32.mrf.mxu2  ;;  %2324 = vmatpush.bf16.msrb.mxu0 %v3551_v9  ;;  %2282 = vmatpush.bf16.msra.mxu3 %v3530_v11 }
 0x6ea   : > { %2308 = vmatpush.bf16.msra.mxu2 %v3546_v12 }
 0x6eb   : > { %3185 = vmatmul.msk.bf16.vlgmr.msrb.gmra.mxu1 %vm467_vm2, %v3838_v0 }
 0x6ec   : > { %3187 = vmatmul.msk.bf16.vlgmr.msra.gmra.mxu0 %vm467_vm2, %v3838_v0 }
 0x6ed   : > { %2325 = vmatpush.bf16.msrb.mxu0 %v3550_v10  ;;  %2283 = vmatpush.bf16.msra.mxu3 %v3529_v14 }
 0x6ee   : > { %2309 = vmatpush.bf16.msra.mxu2 %v3545_v61 }
 0x6f1   : > { %2326 = vmatpush.bf16.msrb.mxu0 %v3549_v13  ;;  %2284 = vmatpush.bf16.msra.mxu3 %v3528_v17 }
 0x6f2   : > { %2310 = vmatpush.bf16.msra.mxu2 %v3544_v60 }
 0x6f5   : > { %2327 = vmatpush.bf16.msrb.mxu0 %v3548_v16  ;;  %2285 = vmatpush.bf16.msra.mxu3 %v3527_v19 }
 0x6f6   : > { %2311 = vmatpush.bf16.msra.mxu2 %v3543_v20 }
 0x6f7   : > { %3184 = vmatmul.msk.bf16.vlgmr.msrb.gmra.mxu3 %vm467_vm2, %v3838_v0 }
 0x6f8   : > { %3186 = vmatmul.msk.bf16.vlgmr.msrb.gmra.mxu2 %vm467_vm2, %v3838_v0  ;;  %v3534_v0 = vld [vmem:[%s4425_s8 + $0x358] sm:$0xff] }
 0x6f9   : > { %2299 = vmatpush.bf16.msra.mxu1 %v3534_v0  ;;  %2328 = vmatpush.bf16.msrb.mxu0 %v3547_v18 }
 0x6fa   : > { %2286 = vmatpush.bf16.msra.mxu3 %v3526_v21  ;;  %2312 = vmatpush.bf16.msra.mxu2 %v3542_v22 }
 0x6fd   : > { %2300 = vmatpush.bf16.msra.mxu1 %v3533_v58 }
 0x6fe   : > { %2287 = vmatpush.bf16.msra.mxu3 %v3525_v23  ;;  %2313 = vmatpush.bf16.msra.mxu2 %v3541_v24 }
 0x701   : > { %2301 = vmatpush.bf16.msra.mxu1 %v3532_v15  ;;  %v3576_v15 = vld [vmem:[%s4428_s11 + $0x3] ss:$0 sm:$0xff] }
 0x702   : > { %2288 = vmatpush.bf16.msra.mxu3 %v3524_v27  ;;  %2314 = vmatpush.bf16.msra.mxu2 %v3540_v28 }
 0x705   : > { %2302 = vmatpush.bf16.msra.mxu1 %v3531_v4 }
 0x706   : > { %2289 = vmatpush.bf16.msra.mxu3 %v3523_v29  ;;  %2315 = vmatpush.bf16.msra.mxu2 %v3539_v30 }
 0x758   : > { %v1874_v25 = vpop.f32.mrf.mxu1 }
 0x759   : > { %v1900_v26 = vpop.f32.mrf.mxu0 }
 0x760   : > { %v1876_v31 = vpop.f32.mrf.mxu1 }
 0x761   : > { %v1902_v32 = vpop.f32.mrf.mxu0 }
 0x762   : > { %v3604_v32 = vmov 8.0  }
 0x768   : > { %v1987_v36 = vpop.f32.mrf.mxu1 }
 0x769   : > { %v1988_v37 = vadd.f32 %v1987_v36, %v1918_v34  ;;  %v2013_v39 = vpop.f32.mrf.mxu0 }
 0x76a   : > { %v2014_v40 = vadd.f32 %v2013_v39, %v1920_v35  ;;  %v1861_v41 = vpop.f32.mrf.mxu3  ;;  %v3578_v39 = vld [vmem:[%s4428_s11 + $0x5] ss:$0 sm:$0xff] }
 0x76b   : > { %v2018_v42 = vmax.f32 %v1988_v37, 0.0  ;;  %v1875_v43 = vadd.f32 %v1874_v25, %v1861_v41  ;;  %v1887_v44 = vpop.f32.mrf.mxu2 }
 0x76c   : > { %v2020_v45 = vmax.f32 %v2014_v40, 0.0 }
 0x76d   : > { %v2022_v46 = vpack.c.bf16 %v2018_v42, %v2018_v42  ;;  %v1888_v47 = vadd.f32 %v1887_v44, %v1875_v43 }
 0x76e   : > { %v2024_v48 = vpack.c.bf16 %v2020_v45, %v2020_v45 }
 0x76f   : > { %v1901_v49 = vadd.f32 %v1900_v26, %v1888_v47  ;;  %2303 = vmatmul.bf16.vlgmr.msra.gmra.mxu1 %v2022_v46  ;;  %v3556_v26 = vld [vmem:[%s4426_s9 + $0x8] sm:$0xff] }
 0x770   : > { %2329 = vmatmul.bf16.vlgmr.msrb.gmra.mxu0 %v2024_v48  ;;  %v1989_v50 = vpop.f32.mrf.mxu1  ;;  %2409 = vmatpush.bf16.msrb.mxu3 %v3556_v26 }
 0x771   : > { %v1904_v51 = vadd.f32 %v1901_v49, %v4269_v38  ;;  %v2015_v52 = vpop.f32.mrf.mxu0 }
 0x772   : > { %v1863_v53 = vpop.f32.mrf.mxu3 }
 0x773   : > { %v1889_v54 = vpop.f32.mrf.mxu2 }
 0x77a   : > { %v1974_v59 = vpop.f32.mrf.mxu3 }
 0x77b   : > { %v1975_v62 = vadd.f32 %v1974_v59, %v1917_v55  ;;  %v2000_v1 = vpop.f32.mrf.mxu2  ;;  %v2387_v59 = vld [vmem:[%s4428_s11 + $0x6] sm:$0x1] }
 0x77c   : > { %v2001_v2 = vadd.f32 %v2000_v1, %v1919_v56 }
 0x77d   : > { %v2017_v3 = vmax.f32 %v1975_v62, 0.0 }
 0x77e   : > { %v2019_v5 = vmax.f32 %v2001_v2, 0.0  ;;  %v2417_v2 = vld [vmem:[%s4427_s10] sm:$0x1] }
 0x77f   : > { %v2021_v6 = vpack.c.bf16 %v2017_v3, %v2017_v3 }
 0x780   : > { %v2023_v7 = vpack.c.bf16 %v2019_v5, %v2019_v5 }
 0x781   : > { %2290 = vmatmul.bf16.vlgmr.msra.gmra.mxu3 %v2021_v6  ;;  %v2419_v6 = vunpack.c.l.bf16 %v2417_v2 }
 0x782   : > { %2316 = vmatmul.bf16.vlgmr.msra.gmra.mxu2 %v2023_v7  ;;  %v1976_v8 = vpop.f32.mrf.mxu3 }
 0x783   : > { %v2002_v9 = vpop.f32.mrf.mxu2 }
 0x7ec   : > { %v2304_v0 = vpop.f32.mrf.mxu1 }
 0x7ed   : > { %v2330_v10 = vpop.f32.mrf.mxu0 }
 0x7f4   : > { %v2306_v38 = vpop.f32.mrf.mxu1 }
 0x7f5   : > { %v2332_v11 = vpop.f32.mrf.mxu0 }
 0x804   : > { %v2291_v12 = vpop.f32.mrf.mxu3 }
 0x805   : > { %v2305_v58 = vadd.f32 %v2304_v0, %v2291_v12  ;;  %v2317_v13 = vpop.f32.mrf.mxu2 }
 0x807   : > { %v2318_v14 = vadd.f32 %v2317_v13, %v2305_v58 }
 0x809   : > { %v2331_v61 = vadd.f32 %v2330_v10, %v2318_v14  ;;  %v2426_v10 = vld [vmem:[%s4428_s11 + $0x7] sm:$0x1] }
 0x80b   : > { %v2334_v16 = vadd.f32 %v2331_v61, %v1904_v51 }
 0x80c   : > { %v2293_v17 = vpop.f32.mrf.mxu3 }
 0x80d   : > { %v2319_v60 = vpop.f32.mrf.mxu2  ;;  %v2337_v4 = vadd.f32 %v3576_v15, %v2334_v16 }
 0x80f   : > { %v2338_v18 = vadd.f32 %v2337_v4, %v3834_v63  ;;  %v3555_v63 = vld [vmem:[%s4426_s9] sm:$0xff] }
 0x810   : > { %2410 = vmatpush.bf16.msrb.mxu3 %v3555_v63 }
 0x811   : > { %v2341_v19 = vsel %vm467_vm2, %v2338_v18, 0.0 }
 0x812   : > { %2342 = vadd.xlane.f32.xlu1 %v2341_v19 }
 0x885   : > { %v2343_v20 = vpop.xlane.xlu1 %2342 }
 0x886   : > { %v2344_v21 = vmul.f32 %v2343_v20, %v3722_v57 }
 0x888   : > { %v2345_v22 = vsub.f32 %v2338_v18, %v2344_v21 }
 0x88a   : > { %v2346_v23 = vmul.f32 %v2345_v22, %v2345_v22 }
 0x88c   : > { %v2347_v24 = vsel %vm467_vm2, %v2346_v23, 0.0 }
 0x88d   : > { %2348 = vadd.xlane.f32.xlu1 %v2347_v24 }
 0x900   : > { %v2349_v25 = vpop.xlane.xlu1 %2348 }
 0x901   : > { %v2350_v27 = vmul.f32 %v2349_v25, %v3722_v57  ;;  %v3577_v57 = vld [vmem:[%s4428_s11 + $0x4] ss:$0 sm:$0xff] }
 0x903   : > { %v2351_v28 = vadd.f32 1e-05, %v2350_v27 }
 0x905   : > { %3587 = vrsqrt.f32 %v2351_v28  ;;  %vm2358_vm10 = vweird.f32 %v2351_v28 }
 0x906   : > { %3589 = vrcp.f32 %v3604_v32 }
 0x90b   : > { %v3588_v29 = vpop.eup %3587 }
 0x90c   : > { %v2353_v30 = vmul.f32 %v3588_v29, %v2351_v28  ;;  %vm2359_vm9 = vweird.f32 %v3588_v29  ;;  %v3590_v35 = vpop.eup %3589 }
 0x90d   : > { %vm2360_vm11 = vmor %vm2358_vm10, %vm2359_vm9  ;;  %v2375_v41 = vmul.f32 8.0, %v3590_v35  ;;  %vm2379_vm12 = vweird.f32 %v3590_v35 }
 0x90e   : > { %v2354_v31 = vmul.f32 %v3588_v29, %v2353_v30 }
 0x90f   : > { %v2376_v44 = vsub.f32 1.0, %v2375_v41 }
 0x910   : > { %v2355_v33 = vmul.f32 0.5, %v2354_v31 }
 0x911   : > { %v2377_v47 = vmul.f32 %v3590_v35, %v2376_v44 }
 0x912   : > { %v2356_v34 = vsub.f32 1.5, %v2355_v33 }
 0x913   : > { %v2378_v50 = vadd.f32 %v3590_v35, %v2377_v47 }
 0x914   : > { %v2357_v36 = vmul.f32 %v3588_v29, %v2356_v34 }
 0x915   : > { %v2380_v53 = vsel %vm2379_vm12, %v3590_v35, %v2378_v50 }
 0x916   : > { %v2361_v37 = vsel %vm2360_vm11, %v3588_v29, %v2357_v36 }
 0x917   : > { %v2362_v40 = vmul.f32 %v2361_v37, %v2345_v22 }
 0x919   : > { %v2364_v42 = vmul.f32 %v3577_v57, %v2362_v40 }
 0x91b   : > { %v2366_v43 = vadd.f32 %v3578_v39, %v2364_v42 }
 0x91d   : > { %v2367_v45 = vsel %vm467_vm2, %v2366_v43, 0.0 }
 0x91e   : > { %v2368_v46 = vrot.slane %v2367_v45, 4 }
 0x920   : > { %v2369_v48 = vadd.f32 %v2368_v46, %v2367_v45 }
 0x922   : > { %v2370_v49 = vrot.slane %v2369_v48, 2 }
 0x924   : > { %v2371_v51 = vadd.f32 %v2370_v49, %v2369_v48 }
 0x926   : > { %v2372_v52 = vrot.slane %v2371_v51, 1 }
 0x928   : > { %v2373_v54 = vadd.f32 %v2372_v52, %v2371_v51 }
 0x92a   : > { %v2381_v55 = vmul.f32 %v2380_v53, %v2373_v54 }
 0x92c   : > { %v2382_v56 = vpack.c.bf16 %v2381_v55, %v2381_v55 }
 0x92e   : > { %3388 = vmatmul.msk.bf16.vlgmr.msrb.gmra.mxu3 %vm467_vm2, %v2382_v56 }
 0x9b1   : > { %v2412_v62 = vpop.f32.mrf.mxu3 }
 0x9b2   : > { %v2413_v1 = vadd.f32 %v2412_v62, %v2387_v59 }
 0x9b4   : > { %v2416_v3 = vmax.f32 %v2413_v1, 0.0 }
 0x9b6   : > { %v2418_v5 = vpack.c.bf16 %v2416_v3, %v2416_v3 }
 0x9b8   : > { %v2420_v7 = vunpack.c.l.bf16 %v2418_v5 }
 0x9b9   : > { %v2414_v8 = vpop.f32.mrf.mxu3 }
 0x9ba   : > { %v2421_v9 = vmul.f32 %v2420_v7, %v2419_v6 }
 0x9bc   : > { %v2423_v0 = vsel %vm2422_vm13, %v2421_v9, 0.0 }
 0x9bd   : > { %2424 = vadd.xlane.f32.xlu1 %v2423_v0 }
 0xa30   : > { %v2425_v38 = vpop.xlane.xlu1 %2424 }
 0xa31   : > { %v2427_v11 = vadd.f32 %v2426_v10, %v2425_v38 }
 0xa33   : > { %2429 = vst.msk [vmem:[%s406_s13] sm:$0x1] %vm2428_vm14, %v2427_v11 }
 0xa34 PF: > { %s22_s21 = sadd.s32 1, %s3597_s21  }
 0xa35   : > { %p19_p4 = scmp.ge.s32.totalorder %s22_s21, 4  }
 0xa37   :  { %21 = sbr.rel (!%p19_p4) target bundleno = 1 (0x1), region = 107 }

</bundles_post_ra>
